<compile_context>
chip_gen: v7x
topology: tpu7x:2x2x1
jax: 0.10.0
libtpu: 0.0.40
codegen_flags: <defaults>
</compile_context>

<pallas_src>
import math

import jax
import jax.numpy as jnp
from jax import lax
from jax.experimental import pallas as pl
from jax.experimental.pallas import tpu as pltpu


# Above the 16/32 MiB scoped defaults, below v7x's 64 MiB physical VMEM.
_VMEM_LIMIT = 56 * 1024 * 1024


def _round_up(x, m):
    return (x + m - 1) // m * m


# ---------------------------------------------------------------------------
# Kernel 1: sequential LSTM recurrence (single invocation, everything in VMEM)
# ---------------------------------------------------------------------------
def _lstm_recurrence_kernel(x_ref, wih_ref, whh_ref, b_ref, h_out_ref, gx_sc):
    T, Bp, E = x_ref.shape
    Hp = whh_ref.shape[0]

    # Hoisted input projection for ALL timesteps (bias folded in): one big
    # (T*Bp, E) @ (E, 4Hp) matmul instead of T tiny ones inside the serial
    # loop.  x is already bf16; result cached in a bf16 scratch (halves the
    # largest VMEM buffer of this kernel).
    x2d = x_ref[...].reshape(T * Bp, E)
    gx = jnp.dot(x2d, wih_ref[...], preferred_element_type=jnp.float32) + b_ref[...]
    gx_sc[...] = gx.reshape(T, Bp, 4 * Hp).astype(gx_sc.dtype)

    def step(t, carry):
        h, c = carry
        # gates_t = (x_t @ W_ih + b) + h_{t-1} @ W_hh  -- one MXU matmul/step.
        # Cast the bf16 cached term up to f32 before the add (v5e has no bf16
        # VALU); gate math stays f32.
        gates = gx_sc[t].astype(jnp.float32) + jnp.dot(
            h.astype(whh_ref.dtype), whh_ref[...],
            preferred_element_type=jnp.float32)
        # Gate layout is (i, f, o, g), each block Hp-wide (lane aligned):
        # one wide sigmoid over 3*Hp lanes + one tanh over Hp lanes.
        sig = jax.nn.sigmoid(gates[:, :3 * Hp])
        i_g = sig[:, 0 * Hp:1 * Hp]
        f_g = sig[:, 1 * Hp:2 * Hp]
        o_g = sig[:, 2 * Hp:3 * Hp]
        g_g = jnp.tanh(gates[:, 3 * Hp:4 * Hp])
        c_new = f_g * c + i_g * g_g
        h_new = o_g * jnp.tanh(c_new)
        h_out_ref[t] = h_new.astype(h_out_ref.dtype)   # bf16 writeback
        return h_new, c_new

    h0 = jnp.zeros((Bp, Hp), jnp.float32)
    c0 = jnp.zeros((Bp, Hp), jnp.float32)
    # Bounded unroll: full unroll only for short sequences.
    unroll = T if T <= 8 else 4
    lax.fori_loop(0, T, step, (h0, c0), unroll=unroll)


# ---------------------------------------------------------------------------
# Kernel 2: hoisted output projection.  h arrives batch-first (Bp, T, Hp) so
# the store is a single contiguous lane/sublane-dense block (no per-t strided
# writes).  Gridded over (batch tiles, vocab tiles), both "parallel".
# ---------------------------------------------------------------------------
def _proj_kernel(h_ref, w_ref, b_ref, out_ref):
    tB, T, Hp = h_ref.shape
    h2d = h_ref[...].reshape(tB * T, Hp)                     # bf16 already
    logits = jnp.dot(h2d, w_ref[...], preferred_element_type=jnp.float32) + b_ref[...]
    out_ref[...] = logits.reshape(tB, T, -1).astype(out_ref.dtype)


# ---------------------------------------------------------------------------
# Wrapper
# ---------------------------------------------------------------------------
def _pad_gate_blocks(w, H, Hp):
    """(..., 4H) PyTorch gate order (i, f, g, o) -> (..., 4Hp) in order
    (i, f, o, g); each gate block starts at its own lane-aligned Hp-wide slot
    (zero padded) so the three sigmoid gates are contiguous."""
    parts = []
    for g in (0, 1, 3, 2):                    # i, f, o, g
        blk = w[..., g * H:(g + 1) * H]
        if Hp > H:
            blk = jnp.pad(blk, [(0, 0)] * (w.ndim - 1) + [(0, Hp - H)])
        parts.append(blk)
    return jnp.concatenate(parts, axis=-1)


def decoder_rnn_forward(features, captions, params):
    """features: (B, E) f32; captions: (B, T_cap) int32.
    Returns (B, T_cap, V) f32 matching the PyTorch forward (features
    prepended, captions[:, :-1] embedded)."""
    emb_w = params["embed_weight"]      # (V, E)
    w_ih = params["w_ih"]               # (E, 4H)  (already transposed)
    w_hh = params["w_hh"]               # (H, 4H)
    b = params["b"]                     # (1, 4H)  (b_ih + b_hh)
    w_out = params["w_out"]             # (H, V)
    b_out = params["b_out"]             # (1, V)

    B, E = features.shape
    H = w_hh.shape[0]
    V = w_out.shape[1]

    Bp = _round_up(max(B, 8), 8)              # sublane-pad the batch
    Hp = _round_up(max(H, 128), 128)          # lane-aligned gate blocks
    tV = min(512, _round_up(V, 128))          # vocab tile for the projection
    Vp = _round_up(V, tV)
    tB = math.gcd(Bp, 64)                     # batch tile (always divides Bp)

    # Glue: embedding gather in bf16, built time-major directly.
    cap_tm = captions[:, :-1].T                                       # (T-1, B)
    emb = jnp.take(emb_w.astype(jnp.bfloat16), cap_tm, axis=0)        # (T-1, B, E)
    x_tm = jnp.concatenate(
        [features.astype(jnp.bfloat16)[None, :, :], emb], axis=0)     # (T, B, E) bf16
    T = x_tm.shape[0]
    if Bp > B:
        x_tm = jnp.pad(x_tm, ((0, 0), (0, Bp - B), (0, 0)))

    # Pad / re-lay-out weights; matmul operands in bf16.  Padded hidden units
    # get zero weights & biases -> i=f=o=0.5, g=0 -> their c and h stay exactly
    # 0, so padded lanes never perturb the real outputs.
    wih_p = _pad_gate_blocks(w_ih, H, Hp).astype(jnp.bfloat16)             # (E, 4Hp)
    whh_p = _pad_gate_blocks(w_hh, H, Hp)
    whh_p = jnp.pad(whh_p, ((0, Hp - H), (0, 0))).astype(jnp.bfloat16)     # (Hp, 4Hp)
    b_p = _pad_gate_blocks(b, H, Hp).astype(jnp.float32)                   # (1, 4Hp)
    wout_p = jnp.pad(w_out, ((0, Hp - H), (0, Vp - V))).astype(jnp.bfloat16)  # (Hp, Vp)
    bout_p = jnp.pad(b_out, ((0, 0), (0, Vp - V))).astype(jnp.float32)     # (1, Vp)

    # Kernel 1: the serial recurrence (single invocation, no grid); bf16 h out.
    h_all = pl.pallas_call(
        _lstm_recurrence_kernel,
        out_shape=jax.ShapeDtypeStruct((T, Bp, Hp), jnp.bfloat16),
        in_specs=[pl.BlockSpec(memory_space=pltpu.MemorySpace.VMEM)] * 4,
        out_specs=pl.BlockSpec(memory_space=pltpu.MemorySpace.VMEM),
        scratch_shapes=[pltpu.VMEM((T, Bp, 4 * Hp), jnp.bfloat16)],
        compiler_params=pltpu.CompilerParams(vmem_limit_bytes=_VMEM_LIMIT),
    )(x_tm, wih_p, whh_p, b_p)

    # Cheap HBM transpose of the bf16 hidden trajectory (Hp-wide rows, ~V/Hp x
    # less data than transposing logits) so kernel 2 stores one dense block.
    h_bt = jnp.transpose(h_all, (1, 0, 2))                             # (Bp, T, Hp)

    # Kernel 2: output projection, parallel over (batch tiles, vocab tiles).
    out = pl.pallas_call(
        _proj_kernel,
        out_shape=jax.ShapeDtypeStruct((Bp, T, Vp), jnp.float32),
        grid=(Bp // tB, Vp // tV),
        in_specs=[
            pl.BlockSpec((tB, T, Hp), lambda bi, vi: (bi, 0, 0)),
            pl.BlockSpec((Hp, tV), lambda bi, vi: (0, vi)),
            pl.BlockSpec((1, tV), lambda bi, vi: (0, vi)),
        ],
        out_specs=pl.BlockSpec((tB, T, tV), lambda bi, vi: (bi, 0, vi)),
        compiler_params=pltpu.CompilerParams(
            dimension_semantics=("parallel", "parallel"),
            vmem_limit_bytes=_VMEM_LIMIT),
    )(h_bt, wout_p, bout_p)

    return out[:B, :, :V]


def init_params(key, embed_size, hidden_size, vocab_size):
    ks = jax.random.split(key, 7)
    s = 0.1
    return {
        "embed_weight": s * jax.random.normal(ks[0], (vocab_size, embed_size), jnp.float32),
        # stored transposed so the kernel can do x @ W directly
        "w_ih": s * jax.random.normal(ks[1], (embed_size, 4 * hidden_size), jnp.float32),
        "w_hh": s * jax.random.normal(ks[2], (hidden_size, 4 * hidden_size), jnp.float32),
        "b": (s * jax.random.normal(ks[3], (1, 4 * hidden_size), jnp.float32)
              + s * jax.random.normal(ks[4], (1, 4 * hidden_size), jnp.float32)),  # b_ih + b_hh
        "w_out": s * jax.random.normal(ks[5], (hidden_size, vocab_size), jnp.float32),
        "b_out": s * jax.random.normal(ks[6], (1, vocab_size), jnp.float32),
    }


def _reference_forward(features, captions, params):
    """Pure-JAX f32 reference with PyTorch LSTM semantics (gate order i,f,g,o)."""
    emb = jnp.take(params["embed_weight"], captions[:, :-1], axis=0)   # (B, T-1, E)
    x = jnp.concatenate([features[:, None, :], emb], axis=1)           # (B, T, E)
    B = x.shape[0]
    H = params["w_hh"].shape[0]

    def step(carry, x_t):
        h, c = carry
        gates = x_t @ params["w_ih"] + h @ params["w_hh"] + params["b"][0]
        i = jax.nn.sigmoid(gates[:, 0 * H:1 * H])
        f = jax.nn.sigmoid(gates[:, 1 * H:2 * H])
        g = jnp.tanh(gates[:, 2 * H:3 * H])
        o = jax.nn.sigmoid(gates[:, 3 * H:4 * H])
        c = f * c + i * g
        h = o * jnp.tanh(c)
        return (h, c), h

    (_, _), hs = lax.scan(step, (jnp.zeros((B, H)), jnp.zeros((B, H))),
                          jnp.transpose(x, (1, 0, 2)))
    hs = jnp.transpose(hs, (1, 0, 2))                                  # (B, T, H)
    return hs @ params["w_out"] + params["b_out"][0]


if __name__ == "__main__":
    # Small shapes consistent with the module's forward.
    B, T_cap = 2, 8          # batch, caption length (output seq len == T_cap)
    E, H, V = 32, 32, 128    # embed_size, hidden_size, vocab_size

    key = jax.random.PRNGKey(0)
    k_par, k_feat, k_cap = jax.random.split(key, 3)

    params = init_params(k_par, E, H, V)
    features = jax.random.normal(k_feat, (B, E), jnp.float32)
    captions = jax.random.randint(k_cap, (B, T_cap), 0, V, dtype=jnp.int32)

    logits = jax.jit(decoder_rnn_forward)(features, captions, params)
    jax.block_until_ready(logits)
    assert logits.shape == (B, T_cap, V), logits.shape

    # Loose-tolerance parity check vs. a pure-JAX f32 reference (kernels use
    # bf16 matmul operands).
    ref = _reference_forward(features, captions, params)
    max_err = float(jnp.max(jnp.abs(logits - ref)))
    assert max_err < 0.1, f"max abs error vs reference: {max_err}"

    print("KERNEL_OK")
</pallas_src>

<mosaic_0001>
module attributes {stable_mosaic.version = 11 : i64} {
  func.func @_proj_kernel(%arg0: i32, %arg1: i32, %arg2: memref<8x8x128xbf16, #tpu.memory_space<vmem>>, %arg3: memref<128x128xbf16, #tpu.memory_space<vmem>>, %arg4: memref<1x128xf32, #tpu.memory_space<vmem>>, %arg5: memref<8x8x128xf32, #tpu.memory_space<vmem>>) attributes {dimension_semantics = [#tpu.dimension_semantics<parallel>, #tpu.dimension_semantics<parallel>], iteration_bounds = array<i64: 1, 1>, scalar_prefetch = 0 : i64, scratch_operands = 0 : i64, tpu.core_type = #tpu.core_type<tc>, window_params = [{transform_indices = @transform_0, window_bounds = array<i64: 8, 8, 128>}, {transform_indices = @transform_1, window_bounds = array<i64: 128, 128>}, {transform_indices = @transform_2, window_bounds = array<i64: 1, 128>}, {transform_indices = @transform_3, window_bounds = array<i64: 8, 8, 128>}]} {
    %c0 = arith.constant 0 : index
    %c0_0 = arith.constant 0 : index
    %c0_1 = arith.constant 0 : index
    %0 = vector.load %arg2[%c0, %c0_0, %c0_1] : memref<8x8x128xbf16, #tpu.memory_space<vmem>>, vector<8x8x128xbf16>
    %1 = vector.shape_cast %0 : vector<8x8x128xbf16> to vector<64x128xbf16>
    %c0_2 = arith.constant 0 : index
    %c0_3 = arith.constant 0 : index
    %2 = vector.load %arg3[%c0_2, %c0_3] : memref<128x128xbf16, #tpu.memory_space<vmem>>, vector<128x128xbf16>
    %cst = arith.constant dense<0.000000e+00> : vector<64x128xf32>
    %3 = tpu.matmul %1, %2, %cst {dimension_numbers = #tpu.dot_dimension_numbers<[1], [0], [0], [1], [0, 0, 1, 1], [], []>} : vector<64x128xbf16>, vector<128x128xbf16>, vector<64x128xf32> -> vector<64x128xf32>
    %c0_4 = arith.constant 0 : index
    %c0_5 = arith.constant 0 : index
    %4 = vector.load %arg4[%c0_4, %c0_5] : memref<1x128xf32, #tpu.memory_space<vmem>>, vector<1x128xf32>
    %5 = vector.broadcast %4 : vector<1x128xf32> to vector<64x128xf32>
    %6 = arith.addf %3, %5 : vector<64x128xf32>
    %7 = vector.shape_cast %6 : vector<64x128xf32> to vector<8x8x128xf32>
    %c0_6 = arith.constant 0 : index
    %c0_7 = arith.constant 0 : index
    %c0_8 = arith.constant 0 : index
    %8 = vector.load %arg5[%c0_6, %c0_7, %c0_8] : memref<8x8x128xf32, #tpu.memory_space<vmem>>, vector<8x8x128xf32>
    tpu.vector_store %arg5[%c0_6, %c0_7, %c0_8], %7 {strides = array<i32>} : memref<8x8x128xf32, #tpu.memory_space<vmem>>, vector<8x8x128xf32>,
    return
  }
  func.func @transform_0(%arg0: i32, %arg1: i32) -> (i32, i32, i32) {
    %c0_i32 = arith.constant 0 : i32
    %c0_i32_0 = arith.constant 0 : i32
    %c0_i32_1 = arith.constant 0 : i32
    return %arg0, %c0_i32, %c0_i32_0 : i32, i32, i32
  }
  func.func @transform_1(%arg0: i32, %arg1: i32) -> (i32, i32) {
    %c0_i32 = arith.constant 0 : i32
    %c0_i32_0 = arith.constant 0 : i32
    return %c0_i32, %arg1 : i32, i32
  }
  func.func @transform_2(%arg0: i32, %arg1: i32) -> (i32, i32) {
    %c0_i32 = arith.constant 0 : i32
    %c0_i32_0 = arith.constant 0 : i32
    return %c0_i32, %arg1 : i32, i32
  }
  func.func @transform_3(%arg0: i32, %arg1: i32) -> (i32, i32, i32) {
    %c0_i32 = arith.constant 0 : i32
    %c0_i32_0 = arith.constant 0 : i32
    return %arg0, %c0_i32, %arg1 : i32, i32, i32
  }
}

module attributes {stable_mosaic.version = 11 : i64} {
  func.func @_lstm_recurrence_kernel(%arg0: memref<8x8x32xbf16, #tpu.memory_space<vmem>>, %arg1: memref<32x512xbf16, #tpu.memory_space<vmem>>, %arg2: memref<128x512xbf16, #tpu.memory_space<vmem>>, %arg3: memref<1x512xf32, #tpu.memory_space<vmem>>, %arg4: memref<8x8x128xbf16, #tpu.memory_space<vmem>>, %arg5: memref<8x8x512xbf16, #tpu.memory_space<vmem>>) attributes {dimension_semantics = [], scalar_prefetch = 0 : i64, scratch_operands = 1 : i64, tpu.core_type = #tpu.core_type<tc>} {
    %c0 = arith.constant 0 : index
    %c0_0 = arith.constant 0 : index
    %c0_1 = arith.constant 0 : index
    %0 = vector.load %arg0[%c0, %c0_0, %c0_1] : memref<8x8x32xbf16, #tpu.memory_space<vmem>>, vector<8x8x32xbf16>
    %1 = vector.shape_cast %0 : vector<8x8x32xbf16> to vector<64x32xbf16>
    %c0_2 = arith.constant 0 : index
    %c0_3 = arith.constant 0 : index
    %2 = vector.load %arg1[%c0_2, %c0_3] : memref<32x512xbf16, #tpu.memory_space<vmem>>, vector<32x512xbf16>
    %cst = arith.constant dense<0.000000e+00> : vector<64x512xf32>
    %3 = tpu.matmul %1, %2, %cst {dimension_numbers = #tpu.dot_dimension_numbers<[1], [0], [0], [1], [0, 0, 1, 1], [], []>} : vector<64x32xbf16>, vector<32x512xbf16>, vector<64x512xf32> -> vector<64x512xf32>
    %c0_4 = arith.constant 0 : index
    %c0_5 = arith.constant 0 : index
    %4 = vector.load %arg3[%c0_4, %c0_5] : memref<1x512xf32, #tpu.memory_space<vmem>>, vector<1x512xf32>
    %5 = vector.broadcast %4 : vector<1x512xf32> to vector<64x512xf32>
    %6 = arith.addf %3, %5 : vector<64x512xf32>
    %7 = vector.shape_cast %6 : vector<64x512xf32> to vector<8x8x512xf32>
    %8 = arith.truncf %7 : vector<8x8x512xf32> to vector<8x8x512xbf16>
    %c0_6 = arith.constant 0 : index
    %c0_7 = arith.constant 0 : index
    %c0_8 = arith.constant 0 : index
    %9 = vector.load %arg5[%c0_6, %c0_7, %c0_8] : memref<8x8x512xbf16, #tpu.memory_space<vmem>>, vector<8x8x512xbf16>
    tpu.vector_store %arg5[%c0_6, %c0_7, %c0_8], %8 {strides = array<i32>} : memref<8x8x512xbf16, #tpu.memory_space<vmem>>, vector<8x8x512xbf16>,
    %cst_9 = arith.constant 0.000000e+00 : f32
    %10 = vector.broadcast %cst_9 : f32 to vector<8x128xf32>
    %cst_10 = arith.constant 0.000000e+00 : f32
    %11 = vector.broadcast %cst_10 : f32 to vector<8x128xf32>
    %c0_i32 = arith.constant 0 : i32
    %12 = arith.index_cast %c0_i32 : i32 to index
    %c0_11 = arith.constant 0 : index
    %c0_12 = arith.constant 0 : index
    %13 = vector.load %arg5[%12, %c0_11, %c0_12] : memref<8x8x512xbf16, #tpu.memory_space<vmem>>, vector<1x8x512xbf16>
    %14 = vector.shape_cast %13 : vector<1x8x512xbf16> to vector<8x512xbf16>
    %15 = arith.extf %14 : vector<8x512xbf16> to vector<8x512xf32>
    %16 = arith.truncf %10 : vector<8x128xf32> to vector<8x128xbf16>
    %c0_13 = arith.constant 0 : index
    %c0_14 = arith.constant 0 : index
    %17 = vector.load %arg2[%c0_13, %c0_14] : memref<128x512xbf16, #tpu.memory_space<vmem>>, vector<128x512xbf16>
    %cst_15 = arith.constant dense<0.000000e+00> : vector<8x512xf32>
    %18 = tpu.matmul %16, %17, %cst_15 {dimension_numbers = #tpu.dot_dimension_numbers<[1], [0], [0], [1], [0, 0, 1, 1], [], []>} : vector<8x128xbf16>, vector<128x512xbf16>, vector<8x512xf32> -> vector<8x512xf32>
    %19 = arith.addf %15, %18 : vector<8x512xf32>
    %20 = vector.extract_strided_slice %19 {offsets = [0, 0], sizes = [8, 384], strides = [1, 1]} : vector<8x512xf32> to vector<8x384xf32>
    %21 = arith.negf %20 : vector<8x384xf32>
    %22 = math.exp %21 : vector<8x384xf32>
    %cst_16 = arith.constant 1.000000e+00 : f32
    %23 = vector.broadcast %cst_16 : f32 to vector<8x384xf32>
    %24 = arith.addf %23, %22 : vector<8x384xf32>
    %25 = arith.divf %23, %24 : vector<8x384xf32>
    %26 = vector.extract_strided_slice %25 {offsets = [0, 0], sizes = [8, 128], strides = [1, 1]} : vector<8x384xf32> to vector<8x128xf32>
    %27 = vector.extract_strided_slice %25 {offsets = [0, 128], sizes = [8, 128], strides = [1, 1]} : vector<8x384xf32> to vector<8x128xf32>
    %28 = vector.extract_strided_slice %25 {offsets = [0, 256], sizes = [8, 128], strides = [1, 1]} : vector<8x384xf32> to vector<8x128xf32>
    %29 = vector.extract_strided_slice %19 {offsets = [0, 384], sizes = [8, 128], strides = [1, 1]} : vector<8x512xf32> to vector<8x128xf32>
    %30 = math.tanh %29 : vector<8x128xf32>
    %31 = arith.mulf %27, %11 : vector<8x128xf32>
    %32 = arith.mulf %26, %30 : vector<8x128xf32>
    %33 = arith.addf %31, %32 : vector<8x128xf32>
    %34 = math.tanh %33 : vector<8x128xf32>
    %35 = arith.mulf %28, %34 : vector<8x128xf32>
    %36 = arith.truncf %35 : vector<8x128xf32> to vector<8x128xbf16>
    %37 = arith.index_cast %c0_i32 : i32 to index
    %c0_17 = arith.constant 0 : index
    %c0_18 = arith.constant 0 : index
    %38 = vector.load %arg4[%37, %c0_17, %c0_18] : memref<8x8x128xbf16, #tpu.memory_space<vmem>>, vector<1x8x128xbf16>
    %39 = vector.shape_cast %38 : vector<1x8x128xbf16> to vector<8x128xbf16>
    %40 = vector.shape_cast %36 : vector<8x128xbf16> to vector<1x8x128xbf16>
    tpu.vector_store %arg4[%37, %c0_17, %c0_18], %40 {strides = array<i32>} : memref<8x8x128xbf16, #tpu.memory_space<vmem>>, vector<1x8x128xbf16>,
    %c1_i32 = arith.constant 1 : i32
    %41 = arith.index_cast %c1_i32 : i32 to index
    %c0_19 = arith.constant 0 : index
    %c0_20 = arith.constant 0 : index
    %42 = vector.load %arg5[%41, %c0_19, %c0_20] : memref<8x8x512xbf16, #tpu.memory_space<vmem>>, vector<1x8x512xbf16>
    %43 = vector.shape_cast %42 : vector<1x8x512xbf16> to vector<8x512xbf16>
    %44 = arith.extf %43 : vector<8x512xbf16> to vector<8x512xf32>
    %45 = arith.truncf %35 : vector<8x128xf32> to vector<8x128xbf16>
    %c0_21 = arith.constant 0 : index
    %c0_22 = arith.constant 0 : index
    %46 = vector.load %arg2[%c0_21, %c0_22] : memref<128x512xbf16, #tpu.memory_space<vmem>>, vector<128x512xbf16>
    %cst_23 = arith.constant dense<0.000000e+00> : vector<8x512xf32>
    %47 = tpu.matmul %45, %46, %cst_23 {dimension_numbers = #tpu.dot_dimension_numbers<[1], [0], [0], [1], [0, 0, 1, 1], [], []>} : vector<8x128xbf16>, vector<128x512xbf16>, vector<8x512xf32> -> vector<8x512xf32>
    %48 = arith.addf %44, %47 : vector<8x512xf32>
    %49 = vector.extract_strided_slice %48 {offsets = [0, 0], sizes = [8, 384], strides = [1, 1]} : vector<8x512xf32> to vector<8x384xf32>
    %50 = arith.negf %49 : vector<8x384xf32>
    %51 = math.exp %50 : vector<8x384xf32>
    %cst_24 = arith.constant 1.000000e+00 : f32
    %52 = vector.broadcast %cst_24 : f32 to vector<8x384xf32>
    %53 = arith.addf %52, %51 : vector<8x384xf32>
    %54 = arith.divf %52, %53 : vector<8x384xf32>
    %55 = vector.extract_strided_slice %54 {offsets = [0, 0], sizes = [8, 128], strides = [1, 1]} : vector<8x384xf32> to vector<8x128xf32>
    %56 = vector.extract_strided_slice %54 {offsets = [0, 128], sizes = [8, 128], strides = [1, 1]} : vector<8x384xf32> to vector<8x128xf32>
    %57 = vector.extract_strided_slice %54 {offsets = [0, 256], sizes = [8, 128], strides = [1, 1]} : vector<8x384xf32> to vector<8x128xf32>
    %58 = vector.extract_strided_slice %48 {offsets = [0, 384], sizes = [8, 128], strides = [1, 1]} : vector<8x512xf32> to vector<8x128xf32>
    %59 = math.tanh %58 : vector<8x128xf32>
    %60 = arith.mulf %56, %33 : vector<8x128xf32>
    %61 = arith.mulf %55, %59 : vector<8x128xf32>
    %62 = arith.addf %60, %61 : vector<8x128xf32>
    %63 = math.tanh %62 : vector<8x128xf32>
    %64 = arith.mulf %57, %63 : vector<8x128xf32>
    %65 = arith.truncf %64 : vector<8x128xf32> to vector<8x128xbf16>
    %66 = arith.index_cast %c1_i32 : i32 to index
    %c0_25 = arith.constant 0 : index
    %c0_26 = arith.constant 0 : index
    %67 = vector.load %arg4[%66, %c0_25, %c0_26] : memref<8x8x128xbf16, #tpu.memory_space<vmem>>, vector<1x8x128xbf16>
    %68 = vector.shape_cast %67 : vector<1x8x128xbf16> to vector<8x128xbf16>
    %69 = vector.shape_cast %65 : vector<8x128xbf16> to vector<1x8x128xbf16>
    tpu.vector_store %arg4[%66, %c0_25, %c0_26], %69 {strides = array<i32>} : memref<8x8x128xbf16, #tpu.memory_space<vmem>>, vector<1x8x128xbf16>,
    %c2_i32 = arith.constant 2 : i32
    %70 = arith.index_cast %c2_i32 : i32 to index
    %c0_27 = arith.constant 0 : index
    %c0_28 = arith.constant 0 : index
    %71 = vector.load %arg5[%70, %c0_27, %c0_28] : memref<8x8x512xbf16, #tpu.memory_space<vmem>>, vector<1x8x512xbf16>
    %72 = vector.shape_cast %71 : vector<1x8x512xbf16> to vector<8x512xbf16>
    %73 = arith.extf %72 : vector<8x512xbf16> to vector<8x512xf32>
    %74 = arith.truncf %64 : vector<8x128xf32> to vector<8x128xbf16>
    %c0_29 = arith.constant 0 : index
    %c0_30 = arith.constant 0 : index
    %75 = vector.load %arg2[%c0_29, %c0_30] : memref<128x512xbf16, #tpu.memory_space<vmem>>, vector<128x512xbf16>
    %cst_31 = arith.constant dense<0.000000e+00> : vector<8x512xf32>
    %76 = tpu.matmul %74, %75, %cst_31 {dimension_numbers = #tpu.dot_dimension_numbers<[1], [0], [0], [1], [0, 0, 1, 1], [], []>} : vector<8x128xbf16>, vector<128x512xbf16>, vector<8x512xf32> -> vector<8x512xf32>
    %77 = arith.addf %73, %76 : vector<8x512xf32>
    %78 = vector.extract_strided_slice %77 {offsets = [0, 0], sizes = [8, 384], strides = [1, 1]} : vector<8x512xf32> to vector<8x384xf32>
    %79 = arith.negf %78 : vector<8x384xf32>
    %80 = math.exp %79 : vector<8x384xf32>
    %cst_32 = arith.constant 1.000000e+00 : f32
    %81 = vector.broadcast %cst_32 : f32 to vector<8x384xf32>
    %82 = arith.addf %81, %80 : vector<8x384xf32>
    %83 = arith.divf %81, %82 : vector<8x384xf32>
    %84 = vector.extract_strided_slice %83 {offsets = [0, 0], sizes = [8, 128], strides = [1, 1]} : vector<8x384xf32> to vector<8x128xf32>
    %85 = vector.extract_strided_slice %83 {offsets = [0, 128], sizes = [8, 128], strides = [1, 1]} : vector<8x384xf32> to vector<8x128xf32>
    %86 = vector.extract_strided_slice %83 {offsets = [0, 256], sizes = [8, 128], strides = [1, 1]} : vector<8x384xf32> to vector<8x128xf32>
    %87 = vector.extract_strided_slice %77 {offsets = [0, 384], sizes = [8, 128], strides = [1, 1]} : vector<8x512xf32> to vector<8x128xf32>
    %88 = math.tanh %87 : vector<8x128xf32>
    %89 = arith.mulf %85, %62 : vector<8x128xf32>
    %90 = arith.mulf %84, %88 : vector<8x128xf32>
    %91 = arith.addf %89, %90 : vector<8x128xf32>
    %92 = math.tanh %91 : vector<8x128xf32>
    %93 = arith.mulf %86, %92 : vector<8x128xf32>
    %94 = arith.truncf %93 : vector<8x128xf32> to vector<8x128xbf16>
    %95 = arith.index_cast %c2_i32 : i32 to index
    %c0_33 = arith.constant 0 : index
    %c0_34 = arith.constant 0 : index
    %96 = vector.load %arg4[%95, %c0_33, %c0_34] : memref<8x8x128xbf16, #tpu.memory_space<vmem>>, vector<1x8x128xbf16>
    %97 = vector.shape_cast %96 : vector<1x8x128xbf16> to vector<8x128xbf16>
    %98 = vector.shape_cast %94 : vector<8x128xbf16> to vector<1x8x128xbf16>
    tpu.vector_store %arg4[%95, %c0_33, %c0_34], %98 {strides = array<i32>} : memref<8x8x128xbf16, #tpu.memory_space<vmem>>, vector<1x8x128xbf16>,
    %c3_i32 = arith.constant 3 : i32
    %99 = arith.index_cast %c3_i32 : i32 to index
    %c0_35 = arith.constant 0 : index
    %c0_36 = arith.constant 0 : index
    %100 = vector.load %arg5[%99, %c0_35, %c0_36] : memref<8x8x512xbf16, #tpu.memory_space<vmem>>, vector<1x8x512xbf16>
    %101 = vector.shape_cast %100 : vector<1x8x512xbf16> to vector<8x512xbf16>
    %102 = arith.extf %101 : vector<8x512xbf16> to vector<8x512xf32>
    %103 = arith.truncf %93 : vector<8x128xf32> to vector<8x128xbf16>
    %c0_37 = arith.constant 0 : index
    %c0_38 = arith.constant 0 : index
    %104 = vector.load %arg2[%c0_37, %c0_38] : memref<128x512xbf16, #tpu.memory_space<vmem>>, vector<128x512xbf16>
    %cst_39 = arith.constant dense<0.000000e+00> : vector<8x512xf32>
    %105 = tpu.matmul %103, %104, %cst_39 {dimension_numbers = #tpu.dot_dimension_numbers<[1], [0], [0], [1], [0, 0, 1, 1], [], []>} : vector<8x128xbf16>, vector<128x512xbf16>, vector<8x512xf32> -> vector<8x512xf32>
    %106 = arith.addf %102, %105 : vector<8x512xf32>
    %107 = vector.extract_strided_slice %106 {offsets = [0, 0], sizes = [8, 384], strides = [1, 1]} : vector<8x512xf32> to vector<8x384xf32>
    %108 = arith.negf %107 : vector<8x384xf32>
    %109 = math.exp %108 : vector<8x384xf32>
    %cst_40 = arith.constant 1.000000e+00 : f32
    %110 = vector.broadcast %cst_40 : f32 to vector<8x384xf32>
    %111 = arith.addf %110, %109 : vector<8x384xf32>
    %112 = arith.divf %110, %111 : vector<8x384xf32>
    %113 = vector.extract_strided_slice %112 {offsets = [0, 0], sizes = [8, 128], strides = [1, 1]} : vector<8x384xf32> to vector<8x128xf32>
    %114 = vector.extract_strided_slice %112 {offsets = [0, 128], sizes = [8, 128], strides = [1, 1]} : vector<8x384xf32> to vector<8x128xf32>
    %115 = vector.extract_strided_slice %112 {offsets = [0, 256], sizes = [8, 128], strides = [1, 1]} : vector<8x384xf32> to vector<8x128xf32>
    %116 = vector.extract_strided_slice %106 {offsets = [0, 384], sizes = [8, 128], strides = [1, 1]} : vector<8x512xf32> to vector<8x128xf32>
    %117 = math.tanh %116 : vector<8x128xf32>
    %118 = arith.mulf %114, %91 : vector<8x128xf32>
    %119 = arith.mulf %113, %117 : vector<8x128xf32>
    %120 = arith.addf %118, %119 : vector<8x128xf32>
    %121 = math.tanh %120 : vector<8x128xf32>
    %122 = arith.mulf %115, %121 : vector<8x128xf32>
    %123 = arith.truncf %122 : vector<8x128xf32> to vector<8x128xbf16>
    %124 = arith.index_cast %c3_i32 : i32 to index
    %c0_41 = arith.constant 0 : index
    %c0_42 = arith.constant 0 : index
    %125 = vector.load %arg4[%124, %c0_41, %c0_42] : memref<8x8x128xbf16, #tpu.memory_space<vmem>>, vector<1x8x128xbf16>
    %126 = vector.shape_cast %125 : vector<1x8x128xbf16> to vector<8x128xbf16>
    %127 = vector.shape_cast %123 : vector<8x128xbf16> to vector<1x8x128xbf16>
    tpu.vector_store %arg4[%124, %c0_41, %c0_42], %127 {strides = array<i32>} : memref<8x8x128xbf16, #tpu.memory_space<vmem>>, vector<1x8x128xbf16>,
    %c4_i32 = arith.constant 4 : i32
    %128 = arith.index_cast %c4_i32 : i32 to index
    %c0_43 = arith.constant 0 : index
    %c0_44 = arith.constant 0 : index
    %129 = vector.load %arg5[%128, %c0_43, %c0_44] : memref<8x8x512xbf16, #tpu.memory_space<vmem>>, vector<1x8x512xbf16>
    %130 = vector.shape_cast %129 : vector<1x8x512xbf16> to vector<8x512xbf16>
    %131 = arith.extf %130 : vector<8x512xbf16> to vector<8x512xf32>
    %132 = arith.truncf %122 : vector<8x128xf32> to vector<8x128xbf16>
    %c0_45 = arith.constant 0 : index
    %c0_46 = arith.constant 0 : index
    %133 = vector.load %arg2[%c0_45, %c0_46] : memref<128x512xbf16, #tpu.memory_space<vmem>>, vector<128x512xbf16>
    %cst_47 = arith.constant dense<0.000000e+00> : vector<8x512xf32>
    %134 = tpu.matmul %132, %133, %cst_47 {dimension_numbers = #tpu.dot_dimension_numbers<[1], [0], [0], [1], [0, 0, 1, 1], [], []>} : vector<8x128xbf16>, vector<128x512xbf16>, vector<8x512xf32> -> vector<8x512xf32>
    %135 = arith.addf %131, %134 : vector<8x512xf32>
    %136 = vector.extract_strided_slice %135 {offsets = [0, 0], sizes = [8, 384], strides = [1, 1]} : vector<8x512xf32> to vector<8x384xf32>
    %137 = arith.negf %136 : vector<8x384xf32>
    %138 = math.exp %137 : vector<8x384xf32>
    %cst_48 = arith.constant 1.000000e+00 : f32
    %139 = vector.broadcast %cst_48 : f32 to vector<8x384xf32>
    %140 = arith.addf %139, %138 : vector<8x384xf32>
    %141 = arith.divf %139, %140 : vector<8x384xf32>
    %142 = vector.extract_strided_slice %141 {offsets = [0, 0], sizes = [8, 128], strides = [1, 1]} : vector<8x384xf32> to vector<8x128xf32>
    %143 = vector.extract_strided_slice %141 {offsets = [0, 128], sizes = [8, 128], strides = [1, 1]} : vector<8x384xf32> to vector<8x128xf32>
    %144 = vector.extract_strided_slice %141 {offsets = [0, 256], sizes = [8, 128], strides = [1, 1]} : vector<8x384xf32> to vector<8x128xf32>
    %145 = vector.extract_strided_slice %135 {offsets = [0, 384], sizes = [8, 128], strides = [1, 1]} : vector<8x512xf32> to vector<8x128xf32>
    %146 = math.tanh %145 : vector<8x128xf32>
    %147 = arith.mulf %143, %120 : vector<8x128xf32>
    %148 = arith.mulf %142, %146 : vector<8x128xf32>
    %149 = arith.addf %147, %148 : vector<8x128xf32>
    %150 = math.tanh %149 : vector<8x128xf32>
    %151 = arith.mulf %144, %150 : vector<8x128xf32>
    %152 = arith.truncf %151 : vector<8x128xf32> to vector<8x128xbf16>
    %153 = arith.index_cast %c4_i32 : i32 to index
    %c0_49 = arith.constant 0 : index
    %c0_50 = arith.constant 0 : index
    %154 = vector.load %arg4[%153, %c0_49, %c0_50] : memref<8x8x128xbf16, #tpu.memory_space<vmem>>, vector<1x8x128xbf16>
    %155 = vector.shape_cast %154 : vector<1x8x128xbf16> to vector<8x128xbf16>
    %156 = vector.shape_cast %152 : vector<8x128xbf16> to vector<1x8x128xbf16>
    tpu.vector_store %arg4[%153, %c0_49, %c0_50], %156 {strides = array<i32>} : memref<8x8x128xbf16, #tpu.memory_space<vmem>>, vector<1x8x128xbf16>,
    %c5_i32 = arith.constant 5 : i32
    %157 = arith.index_cast %c5_i32 : i32 to index
    %c0_51 = arith.constant 0 : index
    %c0_52 = arith.constant 0 : index
    %158 = vector.load %arg5[%157, %c0_51, %c0_52] : memref<8x8x512xbf16, #tpu.memory_space<vmem>>, vector<1x8x512xbf16>
    %159 = vector.shape_cast %158 : vector<1x8x512xbf16> to vector<8x512xbf16>
    %160 = arith.extf %159 : vector<8x512xbf16> to vector<8x512xf32>
    %161 = arith.truncf %151 : vector<8x128xf32> to vector<8x128xbf16>
    %c0_53 = arith.constant 0 : index
    %c0_54 = arith.constant 0 : index
    %162 = vector.load %arg2[%c0_53, %c0_54] : memref<128x512xbf16, #tpu.memory_space<vmem>>, vector<128x512xbf16>
    %cst_55 = arith.constant dense<0.000000e+00> : vector<8x512xf32>
    %163 = tpu.matmul %161, %162, %cst_55 {dimension_numbers = #tpu.dot_dimension_numbers<[1], [0], [0], [1], [0, 0, 1, 1], [], []>} : vector<8x128xbf16>, vector<128x512xbf16>, vector<8x512xf32> -> vector<8x512xf32>
    %164 = arith.addf %160, %163 : vector<8x512xf32>
    %165 = vector.extract_strided_slice %164 {offsets = [0, 0], sizes = [8, 384], strides = [1, 1]} : vector<8x512xf32> to vector<8x384xf32>
    %166 = arith.negf %165 : vector<8x384xf32>
    %167 = math.exp %166 : vector<8x384xf32>
    %cst_56 = arith.constant 1.000000e+00 : f32
    %168 = vector.broadcast %cst_56 : f32 to vector<8x384xf32>
    %169 = arith.addf %168, %167 : vector<8x384xf32>
    %170 = arith.divf %168, %169 : vector<8x384xf32>
    %171 = vector.extract_strided_slice %170 {offsets = [0, 0], sizes = [8, 128], strides = [1, 1]} : vector<8x384xf32> to vector<8x128xf32>
    %172 = vector.extract_strided_slice %170 {offsets = [0, 128], sizes = [8, 128], strides = [1, 1]} : vector<8x384xf32> to vector<8x128xf32>
    %173 = vector.extract_strided_slice %170 {offsets = [0, 256], sizes = [8, 128], strides = [1, 1]} : vector<8x384xf32> to vector<8x128xf32>
    %174 = vector.extract_strided_slice %164 {offsets = [0, 384], sizes = [8, 128], strides = [1, 1]} : vector<8x512xf32> to vector<8x128xf32>
    %175 = math.tanh %174 : vector<8x128xf32>
    %176 = arith.mulf %172, %149 : vector<8x128xf32>
    %177 = arith.mulf %171, %175 : vector<8x128xf32>
    %178 = arith.addf %176, %177 : vector<8x128xf32>
    %179 = math.tanh %178 : vector<8x128xf32>
    %180 = arith.mulf %173, %179 : vector<8x128xf32>
    %181 = arith.truncf %180 : vector<8x128xf32> to vector<8x128xbf16>
    %182 = arith.index_cast %c5_i32 : i32 to index
    %c0_57 = arith.constant 0 : index
    %c0_58 = arith.constant 0 : index
    %183 = vector.load %arg4[%182, %c0_57, %c0_58] : memref<8x8x128xbf16, #tpu.memory_space<vmem>>, vector<1x8x128xbf16>
    %184 = vector.shape_cast %183 : vector<1x8x128xbf16> to vector<8x128xbf16>
    %185 = vector.shape_cast %181 : vector<8x128xbf16> to vector<1x8x128xbf16>
    tpu.vector_store %arg4[%182, %c0_57, %c0_58], %185 {strides = array<i32>} : memref<8x8x128xbf16, #tpu.memory_space<vmem>>, vector<1x8x128xbf16>,
    %c6_i32 = arith.constant 6 : i32
    %186 = arith.index_cast %c6_i32 : i32 to index
    %c0_59 = arith.constant 0 : index
    %c0_60 = arith.constant 0 : index
    %187 = vector.load %arg5[%186, %c0_59, %c0_60] : memref<8x8x512xbf16, #tpu.memory_space<vmem>>, vector<1x8x512xbf16>
    %188 = vector.shape_cast %187 : vector<1x8x512xbf16> to vector<8x512xbf16>
    %189 = arith.extf %188 : vector<8x512xbf16> to vector<8x512xf32>
    %190 = arith.truncf %180 : vector<8x128xf32> to vector<8x128xbf16>
    %c0_61 = arith.constant 0 : index
    %c0_62 = arith.constant 0 : index
    %191 = vector.load %arg2[%c0_61, %c0_62] : memref<128x512xbf16, #tpu.memory_space<vmem>>, vector<128x512xbf16>
    %cst_63 = arith.constant dense<0.000000e+00> : vector<8x512xf32>
    %192 = tpu.matmul %190, %191, %cst_63 {dimension_numbers = #tpu.dot_dimension_numbers<[1], [0], [0], [1], [0, 0, 1, 1], [], []>} : vector<8x128xbf16>, vector<128x512xbf16>, vector<8x512xf32> -> vector<8x512xf32>
    %193 = arith.addf %189, %192 : vector<8x512xf32>
    %194 = vector.extract_strided_slice %193 {offsets = [0, 0], sizes = [8, 384], strides = [1, 1]} : vector<8x512xf32> to vector<8x384xf32>
    %195 = arith.negf %194 : vector<8x384xf32>
    %196 = math.exp %195 : vector<8x384xf32>
    %cst_64 = arith.constant 1.000000e+00 : f32
    %197 = vector.broadcast %cst_64 : f32 to vector<8x384xf32>
    %198 = arith.addf %197, %196 : vector<8x384xf32>
    %199 = arith.divf %197, %198 : vector<8x384xf32>
    %200 = vector.extract_strided_slice %199 {offsets = [0, 0], sizes = [8, 128], strides = [1, 1]} : vector<8x384xf32> to vector<8x128xf32>
    %201 = vector.extract_strided_slice %199 {offsets = [0, 128], sizes = [8, 128], strides = [1, 1]} : vector<8x384xf32> to vector<8x128xf32>
    %202 = vector.extract_strided_slice %199 {offsets = [0, 256], sizes = [8, 128], strides = [1, 1]} : vector<8x384xf32> to vector<8x128xf32>
    %203 = vector.extract_strided_slice %193 {offsets = [0, 384], sizes = [8, 128], strides = [1, 1]} : vector<8x512xf32> to vector<8x128xf32>
    %204 = math.tanh %203 : vector<8x128xf32>
    %205 = arith.mulf %201, %178 : vector<8x128xf32>
    %206 = arith.mulf %200, %204 : vector<8x128xf32>
    %207 = arith.addf %205, %206 : vector<8x128xf32>
    %208 = math.tanh %207 : vector<8x128xf32>
    %209 = arith.mulf %202, %208 : vector<8x128xf32>
    %210 = arith.truncf %209 : vector<8x128xf32> to vector<8x128xbf16>
    %211 = arith.index_cast %c6_i32 : i32 to index
    %c0_65 = arith.constant 0 : index
    %c0_66 = arith.constant 0 : index
    %212 = vector.load %arg4[%211, %c0_65, %c0_66] : memref<8x8x128xbf16, #tpu.memory_space<vmem>>, vector<1x8x128xbf16>
    %213 = vector.shape_cast %212 : vector<1x8x128xbf16> to vector<8x128xbf16>
    %214 = vector.shape_cast %210 : vector<8x128xbf16> to vector<1x8x128xbf16>
    tpu.vector_store %arg4[%211, %c0_65, %c0_66], %214 {strides = array<i32>} : memref<8x8x128xbf16, #tpu.memory_space<vmem>>, vector<1x8x128xbf16>,
    %c7_i32 = arith.constant 7 : i32
    %215 = arith.index_cast %c7_i32 : i32 to index
    %c0_67 = arith.constant 0 : index
    %c0_68 = arith.constant 0 : index
    %216 = vector.load %arg5[%215, %c0_67, %c0_68] : memref<8x8x512xbf16, #tpu.memory_space<vmem>>, vector<1x8x512xbf16>
    %217 = vector.shape_cast %216 : vector<1x8x512xbf16> to vector<8x512xbf16>
    %218 = arith.extf %217 : vector<8x512xbf16> to vector<8x512xf32>
    %219 = arith.truncf %209 : vector<8x128xf32> to vector<8x128xbf16>
    %c0_69 = arith.constant 0 : index
    %c0_70 = arith.constant 0 : index
    %220 = vector.load %arg2[%c0_69, %c0_70] : memref<128x512xbf16, #tpu.memory_space<vmem>>, vector<128x512xbf16>
    %cst_71 = arith.constant dense<0.000000e+00> : vector<8x512xf32>
    %221 = tpu.matmul %219, %220, %cst_71 {dimension_numbers = #tpu.dot_dimension_numbers<[1], [0], [0], [1], [0, 0, 1, 1], [], []>} : vector<8x128xbf16>, vector<128x512xbf16>, vector<8x512xf32> -> vector<8x512xf32>
    %222 = arith.addf %218, %221 : vector<8x512xf32>
    %223 = vector.extract_strided_slice %222 {offsets = [0, 0], sizes = [8, 384], strides = [1, 1]} : vector<8x512xf32> to vector<8x384xf32>
    %224 = arith.negf %223 : vector<8x384xf32>
    %225 = math.exp %224 : vector<8x384xf32>
    %cst_72 = arith.constant 1.000000e+00 : f32
    %226 = vector.broadcast %cst_72 : f32 to vector<8x384xf32>
    %227 = arith.addf %226, %225 : vector<8x384xf32>
    %228 = arith.divf %226, %227 : vector<8x384xf32>
    %229 = vector.extract_strided_slice %228 {offsets = [0, 0], sizes = [8, 128], strides = [1, 1]} : vector<8x384xf32> to vector<8x128xf32>
    %230 = vector.extract_strided_slice %228 {offsets = [0, 128], sizes = [8, 128], strides = [1, 1]} : vector<8x384xf32> to vector<8x128xf32>
    %231 = vector.extract_strided_slice %228 {offsets = [0, 256], sizes = [8, 128], strides = [1, 1]} : vector<8x384xf32> to vector<8x128xf32>
    %232 = vector.extract_strided_slice %222 {offsets = [0, 384], sizes = [8, 128], strides = [1, 1]} : vector<8x512xf32> to vector<8x128xf32>
    %233 = math.tanh %232 : vector<8x128xf32>
    %234 = arith.mulf %230, %207 : vector<8x128xf32>
    %235 = arith.mulf %229, %233 : vector<8x128xf32>
    %236 = arith.addf %234, %235 : vector<8x128xf32>
    %237 = math.tanh %236 : vector<8x128xf32>
    %238 = arith.mulf %231, %237 : vector<8x128xf32>
    %239 = arith.truncf %238 : vector<8x128xf32> to vector<8x128xbf16>
    %240 = arith.index_cast %c7_i32 : i32 to index
    %c0_73 = arith.constant 0 : index
    %c0_74 = arith.constant 0 : index
    %241 = vector.load %arg4[%240, %c0_73, %c0_74] : memref<8x8x128xbf16, #tpu.memory_space<vmem>>, vector<1x8x128xbf16>
    %242 = vector.shape_cast %241 : vector<1x8x128xbf16> to vector<8x128xbf16>
    %243 = vector.shape_cast %239 : vector<8x128xbf16> to vector<1x8x128xbf16>
    tpu.vector_store %arg4[%240, %c0_73, %c0_74], %243 {strides = array<i32>} : memref<8x8x128xbf16, #tpu.memory_space<vmem>>, vector<1x8x128xbf16>,
    %c8_i32 = arith.constant 8 : i32
    return
  }
}

</mosaic_0001>

<bundles_post_ra>
// kernel: decoder_rnn_forward.3
= control target key start
LH: loop header
LB: loop body
LE: loop exit
PB: predicated region body
PF: predicated region fallthrough
CT: control target
= control target key end

     0   :  { %s355_s1 = inlined_call_operand.vmem [shape: bf16[128,128], index: 1, kind: input, shape index: {}]   ;;  %s356_s0 = inlined_call_operand.vmem [shape: bf16[8,8,128], index: 0, kind: input, shape index: {}]   ;;  %s357_s2 = inlined_call_operand.vmem [shape: f32[1,128], index: 2, kind: input, shape index: {}]   ;;  %s358_s3 = inlined_call_operand.vmem [shape: f32[8,8,128], index: 3, kind: output, shape index: {}]  }
   0x1   :  { %v260_v0 = vld [vmem:[%s355_s1] sm:$0xff]   ;;  %v261_v1 = vld [vmem:[%s355_s1 + $0x8] sm:$0xff]   ;;  %v262_v2 = vld [vmem:[%s355_s1 + $0x10] sm:$0xff]  }
   0x2   :  { %220 = vmatprep.subr.bf16.mxu0 %v260_v0  ;;  %244 = vmatprep.subr.bf16.mxu1 %v260_v0  ;;  %v263_v3 = vld [vmem:[%s355_s1 + $0x18] sm:$0xff]   ;;  %v268_v4 = vld [vmem:[%s356_s0] sm:$0xff]   ;;  %v269_v5 = vld [vmem:[%s356_s0 + $0x10] sm:$0xff]  }
   0x3   :  { %221 = vmatpush3.bf16.msra.mxu0 %v260_v0  ;;  %252 = vmatpush3.bf16.msra.mxu1 %v260_v0  ;;  %v264_v6 = vld [vmem:[%s355_s1 + $0x20] sm:$0xff]   ;;  %v265_v7 = vld [vmem:[%s355_s1 + $0x28] sm:$0xff]   ;;  %v266_v8 = vld [vmem:[%s355_s1 + $0x30] sm:$0xff]  }
   0x4   :  { %222 = vmatprep.subr.bf16.mxu0 %v261_v1  ;;  %245 = vmatprep.subr.bf16.mxu1 %v261_v1  ;;  %v267_v9 = vld [vmem:[%s355_s1 + $0x38] sm:$0xff]   ;;  %v270_v10 = vld [vmem:[%s356_s0 + $0x8] sm:$0xff]   ;;  %v195_v12 = vld [vmem:[%s357_s2] ss:$0 sm:$0xff] }
   0x5   :  { %236 = vmatprep.mubr.bf16.mxu0 %v268_v4  ;;  %240 = vmatprep.mubr.bf16.mxu1 %v269_v5  ;;  %v271_v11 = vld [vmem:[%s356_s0 + $0x18] sm:$0xff]  }
   0x7   :  { %223 = vmatpush3.bf16.msra.mxu0 %v261_v1  ;;  %253 = vmatpush3.bf16.msra.mxu1 %v261_v1 }
   0x8   :  { %224 = vmatprep.subr.bf16.mxu0 %v262_v2  ;;  %246 = vmatprep.subr.bf16.mxu1 %v262_v2 }
   0xb   :  { %225 = vmatpush3.bf16.msra.mxu0 %v262_v2  ;;  %254 = vmatpush3.bf16.msra.mxu1 %v262_v2 }
   0xc   :  { %226 = vmatprep.subr.bf16.mxu0 %v263_v3  ;;  %247 = vmatprep.subr.bf16.mxu1 %v263_v3 }
   0xf   :  { %227 = vmatpush3.bf16.msra.mxu0 %v263_v3  ;;  %255 = vmatpush3.bf16.msra.mxu1 %v263_v3 }
  0x10   :  { %228 = vmatprep.subr.bf16.mxu0 %v264_v6  ;;  %248 = vmatprep.subr.bf16.mxu1 %v264_v6 }
  0x13   :  { %229 = vmatpush3.bf16.msra.mxu0 %v264_v6  ;;  %256 = vmatpush3.bf16.msra.mxu1 %v264_v6 }
  0x14   :  { %230 = vmatprep.subr.bf16.mxu0 %v265_v7  ;;  %249 = vmatprep.subr.bf16.mxu1 %v265_v7 }
  0x17   :  { %231 = vmatpush3.bf16.msra.mxu0 %v265_v7  ;;  %257 = vmatpush3.bf16.msra.mxu1 %v265_v7 }
  0x18   :  { %232 = vmatprep.subr.bf16.mxu0 %v266_v8  ;;  %250 = vmatprep.subr.bf16.mxu1 %v266_v8 }
  0x1b   :  { %233 = vmatpush3.bf16.msra.mxu0 %v266_v8  ;;  %258 = vmatpush3.bf16.msra.mxu1 %v266_v8 }
  0x1c   :  { %234 = vmatprep.subr.bf16.mxu0 %v267_v9  ;;  %251 = vmatprep.subr.bf16.mxu1 %v267_v9 }
  0x1f   :  { %235 = vmatpush3.bf16.msra.mxu0 %v267_v9  ;;  %259 = vmatpush3.bf16.msra.mxu1 %v267_v9 }
  0x22   :  { %237 = vmatmul.mubr.bf16.vlgmr.msra.gmra.mrb[0].mxu0 %v270_v10  ;;  %241 = vmatmul.mubr.bf16.vlgmr.msra.gmra.mrb[0].mxu1 %v271_v11 }
  0xf5   :  { %v238_v13 = vpop.f32.mrb[0].mxu0  ;;  %v242_v14 = vpop.f32.mrb[0].mxu1 }
  0xf6   :  { %v161_v15 = vadd.f32 %v238_v13, %v195_v12  ;;  %v177_v16 = vadd.f32 %v242_v14, %v195_v12  ;;  %v152_v17 = vpop.f32.mrb[1].mxu0  ;;  %v168_v18 = vpop.f32.mrb[1].mxu1 }
  0xf7   :  { %v153_v19 = vadd.f32 %v195_v12, %v152_v17  ;;  %v169_v20 = vadd.f32 %v195_v12, %v168_v18  ;;  %v239_v21 = vpop.f32.mrb[2].mxu0  ;;  %v243_v22 = vpop.f32.mrb[2].mxu1 }
  0xf8   :  { %185 = vst [vmem:[%s358_s3 + $0x10] sm:$0xff] %v161_v15  ;;  %189 = vst [vmem:[%s358_s3 + $0x30] sm:$0xff] %v177_v16  ;;  %v164_v23 = vadd.f32 %v239_v21, %v195_v12  ;;  %v180_v24 = vadd.f32 %v243_v22, %v195_v12  ;;  %v155_v25 = vpop.f32.mrb[3].mxu0  ;;  %v171_v26 = vpop.f32.mrb[3].mxu1 }
  0xf9   :  { %183 = vst [vmem:[%s358_s3] sm:$0xff] %v153_v19  ;;  %187 = vst [vmem:[%s358_s3 + $0x20] sm:$0xff] %v169_v20  ;;  %v156_v27 = vadd.f32 %v195_v12, %v155_v25  ;;  %v172_v28 = vadd.f32 %v195_v12, %v171_v26 }
  0xfa   :  { %186 = vst [vmem:[%s358_s3 + $0x18] sm:$0xff] %v164_v23  ;;  %190 = vst [vmem:[%s358_s3 + $0x38] sm:$0xff] %v180_v24 }
  0xfb   :  { %184 = vst [vmem:[%s358_s3 + $0x8] sm:$0xff] %v156_v27  ;;  %188 = vst [vmem:[%s358_s3 + $0x28] sm:$0xff] %v172_v28 }

// kernel: decoder_rnn_forward.2
= control target key start
LH: loop header
LB: loop body
LE: loop exit
PB: predicated region body
PF: predicated region fallthrough
CT: control target
= control target key end

     0   :  { %v4357_v1 = vmov 0   ;;  %vm116_vm0 = vcmask 261120   ;;  %v36_v45 = vlaneseq  ;;  %s4352_s1 = inlined_call_operand.vmem [shape: bf16[32,512], index: 1, kind: input, shape index: {}]   ;;  %s4353_s0 = inlined_call_operand.vmem [shape: bf16[8,8,32], index: 0, kind: input, shape index: {}]   ;;  %s4354_s2 = inlined_call_operand.vmem [shape: bf16[128,512], index: 2, kind: input, shape index: {}]   ;;  %s4355_s3 = inlined_call_operand.vmem [shape: f32[1,512], index: 3, kind: input, shape index: {}]   ;;  %s4356_s4 = inlined_call_operand.vmem [shape: bf16[8,8,128], index: 4, kind: output, shape index: {}]  }
   0x1   :  { %v3257_v0 = vld [vmem:[%s4352_s1 + $0x4] ss:$16 sps:$4 sm:$0xff]   ;;  %161 = vmatprep.mubr.bf16.mxu0 %v4357_v1  ;;  %234 = vmatprep.mubr.bf16.mxu1 %v4357_v1  ;;  %v3259_v2 = vld [vmem:[%s4352_s1 + $0xc] ss:$16 sps:$4 sm:$0xff]   ;;  %v3261_v3 = vld [vmem:[%s4352_s1] ss:$16 sps:$4 sm:$0xff]  }
   0x2   :  { %129 = vmatprep.subr.bf16.mxu0 %v3257_v0  ;;  %v3262_v4 = vld [vmem:[%s4352_s1 + $0x8] ss:$16 sps:$4 sm:$0xff]   ;;  %202 = vmatprep.subr.bf16.mxu1 %v3259_v2  ;;  %v3263_v5 = vld [vmem:[%s4352_s1 + $0x24] ss:$16 sps:$4 sm:$0xff]   ;;  %v3265_v6 = vld [vmem:[%s4352_s1 + $0x2c] ss:$16 sps:$4 sm:$0xff]  }
   0x3   :  { %130 = vmatpush1.bf16.msra.mxu0 %v3261_v3  ;;  %203 = vmatpush1.bf16.msra.mxu1 %v3262_v4  ;;  %v3267_v7 = vld [vmem:[%s4352_s1 + $0x20] ss:$16 sps:$4 sm:$0xff]   ;;  %v3268_v8 = vld [vmem:[%s4352_s1 + $0x28] ss:$16 sps:$4 sm:$0xff]   ;;  %v3572_v11 = vld [vmem:[%s4354_s2 + $0x4] ss:$16 sps:$4 sm:$0xff]  }
   0x4   :  { %131 = vmatprep.subr.bf16.mxu0 %v3263_v5  ;;  %204 = vmatprep.subr.bf16.mxu1 %v3265_v6  ;;  %v3269_v9 = vld [vmem:[%s4353_s0] sm:$0xff]   ;;  %v3577_v12 = vld [vmem:[%s4354_s2 + $0x8] ss:$16 sps:$4 sm:$0xff]   ;;  %v3582_v13 = vld [vmem:[%s4354_s2 + $0xc] ss:$16 sps:$4 sm:$0xff]   ;;  %v37_v46 = vshrl.u32 %v36_v45, 7 }
   0x5   :  { %v3567_v10 = vld [vmem:[%s4354_s2] ss:$16 sps:$4 sm:$0xff]   ;;  %v3589_v14 = vld [vmem:[%s4354_s2 + $0x24] ss:$16 sps:$4 sm:$0xff]   ;;  %v3601_v16 = vld [vmem:[%s4354_s2 + $0x2c] ss:$16 sps:$4 sm:$0xff]  }
   0x6   :  { %v3596_v15 = vld [vmem:[%s4354_s2 + $0x20] ss:$16 sps:$4 sm:$0xff]   ;;  %v3608_v17 = vld [vmem:[%s4354_s2 + $0x28] ss:$16 sps:$4 sm:$0xff]   ;;  %v3615_v18 = vld [vmem:[%s4354_s2 + $0x44] ss:$16 sps:$4 sm:$0xff]  }
   0x7   :  { %132 = vmatpush1.bf16.msra.mxu0 %v3267_v7  ;;  %205 = vmatpush1.bf16.msra.mxu1 %v3268_v8  ;;  %v3282_v19 = vld [vmem:[%s4353_s0 + $0x8] sm:$0xff]   ;;  %v3632_v21 = vld [vmem:[%s4354_s2 + $0x40] ss:$16 sps:$4 sm:$0xff]   ;;  %v3644_v23 = vld [vmem:[%s4354_s2 + $0x64] ss:$16 sps:$4 sm:$0xff]   ;;  %v38_v47 = vsub.s32 0, %v37_v46 }
   0x8   :  { %617 = vmatprep.subr.bf16.mxu0 %v3572_v11  ;;  %658 = vmatprep.subr.bf16.mxu1 %v3582_v13  ;;  %v3625_v20 = vld [vmem:[%s4354_s2 + $0x4c] ss:$16 sps:$4 sm:$0xff]   ;;  %v3637_v22 = vld [vmem:[%s4354_s2 + $0x48] ss:$16 sps:$4 sm:$0xff]   ;;  %v3656_v25 = vld [vmem:[%s4354_s2 + $0x60] ss:$16 sps:$4 sm:$0xff]  }
   0x9   :  { %v3649_v24 = vld [vmem:[%s4354_s2 + $0x6c] ss:$16 sps:$4 sm:$0xff]   ;;  %v3663_v26 = vld [vmem:[%s4354_s2 + $0x68] ss:$16 sps:$4 sm:$0xff]   ;;  %v3670_v27 = vld [vmem:[%s4354_s2 + $0x84] ss:$16 sps:$4 sm:$0xff]  }
   0xa   :  { %2929 = vmatmul.mubr.msk.bf16.vlgmr.msra.gmra.mrb[0].mxu0 %vm116_vm0, %v3269_v9  ;;  %2933 = vmatmul.mubr.msk.bf16.vlgmr.msra.gmra.mrb[0].mxu1 %vm116_vm0, %v3269_v9  ;;  %v3675_v28 = vld [vmem:[%s4354_s2 + $0x8c] ss:$16 sps:$4 sm:$0xff]   ;;  %v3295_v29 = vld [vmem:[%s4353_s0 + $0x10] sm:$0xff]   ;;  %v3690_v31 = vld [vmem:[%s4354_s2 + $0x88] ss:$16 sps:$4 sm:$0xff]   ;;  %v46_v48 = vsub.s32 2, %v37_v46 }
   0xb   :  { %618 = vmatpush1.bf16.msra.mxu0 %v3567_v10  ;;  %659 = vmatpush1.bf16.msra.mxu1 %v3577_v12  ;;  %v3685_v30 = vld [vmem:[%s4354_s2 + $0x80] ss:$16 sps:$4 sm:$0xff]   ;;  %v3697_v32 = vld [vmem:[%s4354_s2 + $0xa4] ss:$16 sps:$4 sm:$0xff]   ;;  %v3704_v33 = vld [vmem:[%s4354_s2 + $0xac] ss:$16 sps:$4 sm:$0xff]  }
   0xc   :  { %619 = vmatprep.subr.bf16.mxu0 %v3589_v14  ;;  %660 = vmatprep.subr.bf16.mxu1 %v3601_v16  ;;  %v3711_v34 = vld [vmem:[%s4354_s2 + $0xa0] ss:$16 sps:$4 sm:$0xff]   ;;  %v3716_v35 = vld [vmem:[%s4354_s2 + $0xa8] ss:$16 sps:$4 sm:$0xff]   ;;  %v3723_v36 = vld [vmem:[%s4354_s2 + $0xc4] ss:$16 sps:$4 sm:$0xff]  }
   0xd   :  { %171 = vmatprep.mubr.bf16.mxu0 %v4357_v1  ;;  %244 = vmatprep.mubr.bf16.mxu1 %v4357_v1  ;;  %v3730_v37 = vld [vmem:[%s4354_s2 + $0xcc] ss:$16 sps:$4 sm:$0xff]   ;;  %v3740_v39 = vld [vmem:[%s4354_s2 + $0xc0] ss:$16 sps:$4 sm:$0xff]   ;;  %v3745_v40 = vld [vmem:[%s4354_s2 + $0xc8] ss:$16 sps:$4 sm:$0xff]  }
   0xe   :  { %v3308_v38 = vld [vmem:[%s4353_s0 + $0x18] sm:$0xff]   ;;  %v3750_v41 = vld [vmem:[%s4354_s2 + $0xe4] ss:$16 sps:$4 sm:$0xff]   ;;  %v3764_v43 = vld [vmem:[%s4354_s2 + $0xe0] ss:$16 sps:$4 sm:$0xff]   ;;  %v42_v50 = vsub.s32 1, %v37_v46 }
   0xf   :  { %620 = vmatpush1.bf16.msra.mxu0 %v3596_v15  ;;  %661 = vmatpush1.bf16.msra.mxu1 %v3608_v17  ;;  %v3755_v42 = vld [vmem:[%s4354_s2 + $0xec] ss:$16 sps:$4 sm:$0xff]   ;;  %v3769_v44 = vld [vmem:[%s4354_s2 + $0xe8] ss:$16 sps:$4 sm:$0xff]   ;;  %v34_v49 = vld [vmem:[%s4355_s3] sm:$0xf] }
  0x10   :  { %621 = vmatprep.subr.bf16.mxu0 %v3615_v18  ;;  %662 = vmatprep.subr.bf16.mxu1 %v3625_v20  ;;  %v50_v51 = vsub.s32 3, %v37_v46  ;;  %v3822_v52 = vrot.slane %v34_v49, %v38_v47  ;;  %v3824_v53 = vrot.slane %v34_v49, %v46_v48  ;;  %v3826_v54 = vrot.slane %v34_v49, %v42_v50 }
  0x12   :  { %2930 = vmatmul.mubr.msk.bf16.gmra.mrb[4].mxu0 %vm116_vm0, %v3282_v19  ;;  %2934 = vmatmul.mubr.msk.bf16.gmra.mrb[4].mxu1 %vm116_vm0, %v3282_v19  ;;  %v3828_v55 = vrot.slane %v34_v49, %v50_v51 }
  0x13   :  { %622 = vmatpush1.bf16.msra.mxu0 %v3632_v21  ;;  %663 = vmatpush1.bf16.msra.mxu1 %v3637_v22 }
  0x14   :  { %623 = vmatprep.subr.bf16.mxu0 %v3644_v23  ;;  %664 = vmatprep.subr.bf16.mxu1 %v3649_v24 }
  0x15   :  { %181 = vmatprep.mubr.bf16.mxu0 %v4357_v1  ;;  %254 = vmatprep.mubr.bf16.mxu1 %v4357_v1 }
  0x17   :  { %624 = vmatpush1.bf16.msra.mxu0 %v3656_v25  ;;  %665 = vmatpush1.bf16.msra.mxu1 %v3663_v26 }
  0x18   :  { %625 = vmatprep.subr.bf16.mxu0 %v3670_v27  ;;  %666 = vmatprep.subr.bf16.mxu1 %v3675_v28 }
  0x1a   :  { %2931 = vmatmul.mubr.msk.bf16.gmra.mrb[8].mxu0 %vm116_vm0, %v3295_v29  ;;  %2935 = vmatmul.mubr.msk.bf16.gmra.mrb[8].mxu1 %vm116_vm0, %v3295_v29 }
  0x1b   :  { %626 = vmatpush1.bf16.msra.mxu0 %v3685_v30  ;;  %667 = vmatpush1.bf16.msra.mxu1 %v3690_v31 }
  0x1c   :  { %627 = vmatprep.subr.bf16.mxu0 %v3697_v32  ;;  %668 = vmatprep.subr.bf16.mxu1 %v3704_v33 }
  0x1d   :  { %191 = vmatprep.mubr.bf16.mxu0 %v4357_v1  ;;  %264 = vmatprep.mubr.bf16.mxu1 %v4357_v1 }
  0x1f   :  { %628 = vmatpush1.bf16.msra.mxu0 %v3711_v34  ;;  %669 = vmatpush1.bf16.msra.mxu1 %v3716_v35 }
  0x20   :  { %629 = vmatprep.subr.bf16.mxu0 %v3723_v36  ;;  %670 = vmatprep.subr.bf16.mxu1 %v3730_v37 }
  0x22   :  { %2932 = vmatmul.mubr.msk.bf16.gmra.mrb[12].mxu0 %vm116_vm0, %v3308_v38  ;;  %2936 = vmatmul.mubr.msk.bf16.gmra.mrb[12].mxu1 %vm116_vm0, %v3308_v38 }
  0x23   :  { %630 = vmatpush1.bf16.msra.mxu0 %v3740_v39  ;;  %671 = vmatpush1.bf16.msra.mxu1 %v3745_v40 }
  0x24   :  { %631 = vmatprep.subr.bf16.mxu0 %v3750_v41  ;;  %672 = vmatprep.subr.bf16.mxu1 %v3755_v42 }
  0x25   :  { %649 = vmatprep.mubr.bf16.mxu0 %v4357_v1  ;;  %690 = vmatprep.mubr.bf16.mxu1 %v4357_v1 }
  0x27   :  { %632 = vmatpush1.bf16.msra.mxu0 %v3764_v43  ;;  %673 = vmatpush1.bf16.msra.mxu1 %v3769_v44 }
  0x28   :  { %928 = vmatprep.subr.bf16.mxu0 %v3572_v11  ;;  %969 = vmatprep.subr.bf16.mxu1 %v3582_v13 }
  0x2a   :  { %650 = vmatmul.mubr.bf16.vlgmr.msra.gmra.mrb[16].mxu0 %v4357_v1  ;;  %691 = vmatmul.mubr.bf16.vlgmr.msra.gmra.mrb[16].mxu1 %v4357_v1 }
  0x2b   :  { %929 = vmatpush1.bf16.msra.mxu0 %v3567_v10  ;;  %970 = vmatpush1.bf16.msra.mxu1 %v3577_v12 }
  0x2c   :  { %930 = vmatprep.subr.bf16.mxu0 %v3589_v14  ;;  %971 = vmatprep.subr.bf16.mxu1 %v3601_v16 }
  0x2d   :  { %960 = vmatprep.mubr.bf16.mxu0 %v4357_v1  ;;  %1001 = vmatprep.mubr.bf16.mxu1 %v4357_v1 }
  0x2f   :  { %931 = vmatpush1.bf16.msra.mxu0 %v3596_v15  ;;  %972 = vmatpush1.bf16.msra.mxu1 %v3608_v17 }
  0x30   :  { %932 = vmatprep.subr.bf16.mxu0 %v3615_v18  ;;  %973 = vmatprep.subr.bf16.mxu1 %v3625_v20 }
  0x33   :  { %933 = vmatpush1.bf16.msra.mxu0 %v3632_v21  ;;  %974 = vmatpush1.bf16.msra.mxu1 %v3637_v22 }
  0x34   :  { %934 = vmatprep.subr.bf16.mxu0 %v3644_v23  ;;  %975 = vmatprep.subr.bf16.mxu1 %v3649_v24 }
  0x37   :  { %935 = vmatpush1.bf16.msra.mxu0 %v3656_v25  ;;  %976 = vmatpush1.bf16.msra.mxu1 %v3663_v26 }
  0x38   :  { %936 = vmatprep.subr.bf16.mxu0 %v3670_v27  ;;  %977 = vmatprep.subr.bf16.mxu1 %v3675_v28 }
  0x3b   :  { %937 = vmatpush1.bf16.msra.mxu0 %v3685_v30  ;;  %978 = vmatpush1.bf16.msra.mxu1 %v3690_v31 }
  0x3c   :  { %938 = vmatprep.subr.bf16.mxu0 %v3697_v32  ;;  %979 = vmatprep.subr.bf16.mxu1 %v3704_v33 }
  0x3f   :  { %939 = vmatpush1.bf16.msra.mxu0 %v3711_v34  ;;  %980 = vmatpush1.bf16.msra.mxu1 %v3716_v35 }
  0x40   :  { %940 = vmatprep.subr.bf16.mxu0 %v3723_v36  ;;  %981 = vmatprep.subr.bf16.mxu1 %v3730_v37 }
  0x43   :  { %941 = vmatpush1.bf16.msra.mxu0 %v3740_v39  ;;  %982 = vmatpush1.bf16.msra.mxu1 %v3745_v40 }
  0x44   :  { %942 = vmatprep.subr.bf16.mxu0 %v3750_v41  ;;  %983 = vmatprep.subr.bf16.mxu1 %v3755_v42 }
  0x47   :  { %943 = vmatpush1.bf16.msra.mxu0 %v3764_v43  ;;  %984 = vmatpush1.bf16.msra.mxu1 %v3769_v44 }
  0x48   :  { %1240 = vmatprep.subr.bf16.mxu0 %v3572_v11  ;;  %1281 = vmatprep.subr.bf16.mxu1 %v3582_v13 }
  0xdd   :  { %v163_v56 = vpop.f32.mrb[0].mxu0  ;;  %v236_v57 = vpop.f32.mrb[0].mxu1 }
  0xde   :  { %v164_v58 = vadd.f32 %v163_v56, %v3822_v52  ;;  %v165_v59 = vpop.f32.mrb[1].mxu0  ;;  %v237_v60 = vadd.f32 %v236_v57, %v3824_v53  ;;  %v238_v61 = vpop.f32.mrb[1].mxu1 }
  0xdf   :  { %v166_v62 = vadd.f32 %v165_v59, %v3826_v54  ;;  %v167_v63 = vpop.f32.mrb[2].mxu0  ;;  %v239_v0 = vadd.f32 %v238_v61, %v3828_v55  ;;  %v240_v2 = vpop.f32.mrb[2].mxu1 }
  0xe0   :  { %v168_v3 = vadd.f32 %v167_v63, %v3822_v52  ;;  %v169_v4 = vpop.f32.mrb[3].mxu0  ;;  %v241_v5 = vadd.f32 %v240_v2, %v3824_v53  ;;  %v242_v6 = vpop.f32.mrb[3].mxu1 }
  0xe1   :  { %v3836_v7 = vpack.c.bf16 %v166_v62, %v164_v58  ;;  %v170_v8 = vadd.f32 %v169_v4, %v3826_v54  ;;  %v3839_v9 = vpack.c.bf16 %v239_v0, %v237_v60  ;;  %v243_v11 = vadd.f32 %v242_v6, %v3828_v55 }
  0xe3   :  { %v3842_v13 = vpack.c.bf16 %v170_v8, %v168_v3  ;;  %v3844_v19 = vpack.c.bf16 %v243_v11, %v241_v5 }
  0xe5   :  { %v173_v29 = vpop.f32.mrb[4].mxu0  ;;  %v246_v38 = vpop.f32.mrb[4].mxu1 }
  0xe6   :  { %v174_v45 = vadd.f32 %v173_v29, %v3822_v52  ;;  %v175_v46 = vpop.f32.mrb[5].mxu0  ;;  %v247_v47 = vadd.f32 %v246_v38, %v3824_v53  ;;  %v248_v48 = vpop.f32.mrb[5].mxu1 }
  0xe7   :  { %v176_v49 = vadd.f32 %v175_v46, %v3826_v54  ;;  %v177_v50 = vpop.f32.mrb[6].mxu0  ;;  %v249_v51 = vadd.f32 %v248_v48, %v3828_v55  ;;  %v250_v56 = vpop.f32.mrb[6].mxu1 }
  0xe8   :  { %v178_v57 = vadd.f32 %v177_v50, %v3822_v52  ;;  %v179_v58 = vpop.f32.mrb[7].mxu0  ;;  %v251_v59 = vadd.f32 %v250_v56, %v3824_v53  ;;  %v252_v60 = vpop.f32.mrb[7].mxu1 }
  0xe9   :  { %v3852_v61 = vpack.c.bf16 %v176_v49, %v174_v45  ;;  %v180_v62 = vadd.f32 %v179_v58, %v3826_v54  ;;  %v3855_v63 = vpack.c.bf16 %v249_v51, %v247_v47  ;;  %v253_v0 = vadd.f32 %v252_v60, %v3828_v55 }
  0xeb   :  { %v3858_v2 = vpack.c.bf16 %v180_v62, %v178_v57  ;;  %v3860_v3 = vpack.c.bf16 %v253_v0, %v251_v59 }
  0xed   :  { %v183_v4 = vpop.f32.mrb[8].mxu0  ;;  %v256_v5 = vpop.f32.mrb[8].mxu1 }
  0xee   :  { %v184_v6 = vadd.f32 %v183_v4, %v3822_v52  ;;  %v185_v8 = vpop.f32.mrb[9].mxu0  ;;  %v257_v11 = vadd.f32 %v256_v5, %v3824_v53  ;;  %v258_v29 = vpop.f32.mrb[9].mxu1 }
  0xef   :  { %v186_v38 = vadd.f32 %v185_v8, %v3826_v54  ;;  %v187_v45 = vpop.f32.mrb[10].mxu0  ;;  %v259_v46 = vadd.f32 %v258_v29, %v3828_v55  ;;  %v260_v47 = vpop.f32.mrb[10].mxu1 }
  0xf0   :  { %v188_v48 = vadd.f32 %v187_v45, %v3822_v52  ;;  %v189_v49 = vpop.f32.mrb[11].mxu0  ;;  %v261_v50 = vadd.f32 %v260_v47, %v3824_v53  ;;  %v262_v51 = vpop.f32.mrb[11].mxu1 }
  0xf1   :  { %v3868_v56 = vpack.c.bf16 %v186_v38, %v184_v6  ;;  %v190_v57 = vadd.f32 %v189_v49, %v3826_v54  ;;  %v3871_v58 = vpack.c.bf16 %v259_v46, %v257_v11  ;;  %v263_v59 = vadd.f32 %v262_v51, %v3828_v55 }
  0xf3   :  { %v3874_v60 = vpack.c.bf16 %v190_v57, %v188_v48  ;;  %v3876_v62 = vpack.c.bf16 %v263_v59, %v261_v50 }
  0xf5   :  { %v193_v0 = vpop.f32.mrb[12].mxu0  ;;  %v266_v4 = vpop.f32.mrb[12].mxu1 }
  0xf6   :  { %v194_v5 = vadd.f32 %v193_v0, %v3822_v52  ;;  %v195_v8 = vpop.f32.mrb[13].mxu0  ;;  %v267_v29 = vadd.f32 %v266_v4, %v3824_v53  ;;  %v268_v45 = vpop.f32.mrb[13].mxu1 }
  0xf7   :  { %v196_v6 = vadd.f32 %v195_v8, %v3826_v54  ;;  %v197_v38 = vpop.f32.mrb[14].mxu0  ;;  %v269_v11 = vadd.f32 %v268_v45, %v3828_v55  ;;  %v270_v46 = vpop.f32.mrb[14].mxu1  ;;  %v421_v45 = vunpack.c.l.bf16 %v3836_v7 }
  0xf8   :  { %v198_v47 = vadd.f32 %v197_v38, %v3822_v52  ;;  %v199_v48 = vpop.f32.mrb[15].mxu0  ;;  %v271_v49 = vadd.f32 %v270_v46, %v3824_v53  ;;  %v272_v50 = vpop.f32.mrb[15].mxu1  ;;  %v423_v52 = vunpack.c.l.bf16 %v3839_v9  ;;  %v422_v53 = vunpack.c.h.bf16 %v3836_v7 }
  0xf9   :  { %v3884_v51 = vpack.c.bf16 %v196_v6, %v194_v5  ;;  %v200_v57 = vadd.f32 %v199_v48, %v3826_v54  ;;  %v3887_v59 = vpack.c.bf16 %v269_v11, %v267_v29  ;;  %v273_v0 = vadd.f32 %v272_v50, %v3828_v55 }
  0xfa   :  { %v424_v5 = vunpack.c.h.bf16 %v3839_v9 }
  0xfb   :  { %4362 = vst [vmem:[#allocation3_spill] sm:$0xff] %v3887_v59  ;;  %v3890_v4 = vpack.c.bf16 %v200_v57, %v198_v47  ;;  %v3892_v8 = vpack.c.bf16 %v273_v0, %v271_v49 }
  0xfd   :  { %4363 = vst [vmem:[#allocation4_spill] sm:$0xff] %v3890_v4  ;;  %4364 = vst [vmem:[#allocation5_spill] sm:$0xff] %v3892_v8  ;;  %v651_v38 = vpop.f32.mrb[16].mxu0  ;;  %v692_v1 = vpop.f32.mrb[16].mxu1 }
  0xfe   :  { %v699_v6 = vadd.f32 %v651_v38, %v421_v45  ;;  %v701_v54 = vadd.f32 %v692_v1, %v423_v52  ;;  %v653_v29 = vpop.f32.mrb[17].mxu0  ;;  %v694_v11 = vpop.f32.mrb[17].mxu1 }
  0xff   :  { %v700_v46 = vadd.f32 %v653_v29, %v422_v53  ;;  %v702_v55 = vadd.f32 %v694_v11, %v424_v5  ;;  %v655_v47 = vpop.f32.mrb[18].mxu0  ;;  %v696_v48 = vpop.f32.mrb[18].mxu1 }
 0x100   :  { %v2985_v49 = vmul.f32 -1.442695, %v699_v6  ;;  %v656_v50 = vpop.f32.mrb[19].mxu0  ;;  %v697_v57 = vpop.f32.mrb[19].mxu1  ;;  %v2987_v8 = vmul.f32 -1.442695, %v701_v54 }
 0x101   :  { %v2986_v0 = vmul.f32 -1.442695, %v700_v46 }
 0x102   :  { %3381 = vpow2.f32 %v2985_v49 }
 0x103   :  { %3383 = vpow2.f32 %v2986_v0 }
 0x104   :  { %3385 = vtanh.f32 %v702_v55 }
 0x105   :  { %3387 = vpow2.f32 %v2987_v8 }
 0x10c   :  { %v3382_v4 = vpop.eup %3381 }
 0x10d   :  { %v712_v59 = vadd.f32 1.0, %v3382_v4  ;;  %v3384_v7 = vpop.eup %3383 }
 0x10e   :  { %v713_v1 = vadd.f32 1.0, %v3384_v7  ;;  %v3386_v9 = vpop.eup %3385 }
 0x10f   :  { %3389 = vrcp.f32 %v712_v59  ;;  %v3388_v45 = vpop.eup %3387  ;;  %v4365_v59 = vmov 0  }
 0x110   :  { %3391 = vrcp.f32 %v713_v1  ;;  %v714_v5 = vadd.f32 1.0, %v3388_v45 }
 0x112   :  { %3393 = vrcp.f32 %v714_v5 }
 0x119   :  { %v3390_v52 = vpop.eup %3389 }
 0x11a   :  { %v723_v38 = vmul.f32 %v3390_v52, %v3386_v9  ;;  %v3392_v53 = vpop.eup %3391 }
 0x11b   :  { %v722_v6 = vmul.f32 0.0, %v3392_v53 }
 0x11c   :  { %v3394_v54 = vpop.eup %3393 }
 0x11d   :  { %v3898_v29 = vadd.f32 %v723_v38, %v722_v6 }
 0x11f   :  { %3395 = vtanh.f32 %v3898_v29 }
 0x129   :  { %v3396_v4 = vpop.eup %3395 }
 0x12a   :  { %v726_v11 = vmul.f32 %v3396_v4, %v3394_v54 }
 0x12c   :  { %v727_v46 = vpack.c.bf16 %v726_v11, %v726_v11 }
 0x12e   :  { %728 = vst [vmem:[%s4356_s4] sm:$0xf] %v727_v46  ;;  %961 = vmatmul.mubr.bf16.vlgmr.msra.gmra.mrb[20].mxu0 %v727_v46  ;;  %1002 = vmatmul.mubr.bf16.vlgmr.msra.gmra.mrb[20].mxu1 %v727_v46 }
 0x12f   :  { %1241 = vmatpush1.bf16.msra.mxu0 %v3567_v10  ;;  %1282 = vmatpush1.bf16.msra.mxu1 %v3577_v12  ;;  %v732_v10 = vunpack.c.l.bf16 %v3842_v13  ;;  %v734_v12 = vunpack.c.l.bf16 %v3844_v19 }
 0x130   :  { %1242 = vmatprep.subr.bf16.mxu0 %v3589_v14  ;;  %1283 = vmatprep.subr.bf16.mxu1 %v3601_v16  ;;  %v733_v16 = vunpack.c.h.bf16 %v3842_v13 }
 0x131   :  { %1272 = vmatprep.mubr.bf16.mxu0 %v4365_v59  ;;  %1313 = vmatprep.mubr.bf16.mxu1 %v4365_v59 }
 0x133   :  { %1243 = vmatpush1.bf16.msra.mxu0 %v3596_v15  ;;  %1284 = vmatpush1.bf16.msra.mxu1 %v3608_v17  ;;  %v735_v17 = vunpack.c.h.bf16 %v3844_v19 }
 0x134   :  { %1244 = vmatprep.subr.bf16.mxu0 %v3615_v18  ;;  %1285 = vmatprep.subr.bf16.mxu1 %v3625_v20 }
 0x137   :  { %1245 = vmatpush1.bf16.msra.mxu0 %v3632_v21  ;;  %1286 = vmatpush1.bf16.msra.mxu1 %v3637_v22 }
 0x138   :  { %1246 = vmatprep.subr.bf16.mxu0 %v3644_v23  ;;  %1287 = vmatprep.subr.bf16.mxu1 %v3649_v24 }
 0x13b   :  { %1247 = vmatpush1.bf16.msra.mxu0 %v3656_v25  ;;  %1288 = vmatpush1.bf16.msra.mxu1 %v3663_v26 }
 0x13c   :  { %1248 = vmatprep.subr.bf16.mxu0 %v3670_v27  ;;  %1289 = vmatprep.subr.bf16.mxu1 %v3675_v28 }
 0x13f   :  { %1249 = vmatpush1.bf16.msra.mxu0 %v3685_v30  ;;  %1290 = vmatpush1.bf16.msra.mxu1 %v3690_v31 }
 0x140   :  { %1250 = vmatprep.subr.bf16.mxu0 %v3697_v32  ;;  %1291 = vmatprep.subr.bf16.mxu1 %v3704_v33 }
 0x143   :  { %1251 = vmatpush1.bf16.msra.mxu0 %v3711_v34  ;;  %1292 = vmatpush1.bf16.msra.mxu1 %v3716_v35 }
 0x144   :  { %1252 = vmatprep.subr.bf16.mxu0 %v3723_v36  ;;  %1293 = vmatprep.subr.bf16.mxu1 %v3730_v37 }
 0x147   :  { %1253 = vmatpush1.bf16.msra.mxu0 %v3740_v39  ;;  %1294 = vmatpush1.bf16.msra.mxu1 %v3745_v40 }
 0x148   :  { %1254 = vmatprep.subr.bf16.mxu0 %v3750_v41  ;;  %1295 = vmatprep.subr.bf16.mxu1 %v3755_v42 }
 0x14b   :  { %1255 = vmatpush1.bf16.msra.mxu0 %v3764_v43  ;;  %1296 = vmatpush1.bf16.msra.mxu1 %v3769_v44 }
 0x201   :  { %v962_v14 = vpop.f32.mrb[20].mxu0  ;;  %v1003_v15 = vpop.f32.mrb[20].mxu1 }
 0x202   :  { %v1010_v8 = vadd.f32 %v962_v14, %v732_v10  ;;  %v1012_v55 = vadd.f32 %v1003_v15, %v734_v12  ;;  %v964_v47 = vpop.f32.mrb[21].mxu0  ;;  %v1005_v48 = vpop.f32.mrb[21].mxu1 }
 0x203   :  { %v1011_v49 = vadd.f32 %v964_v47, %v733_v16  ;;  %v1013_v50 = vadd.f32 %v1005_v48, %v735_v17  ;;  %v966_v57 = vpop.f32.mrb[22].mxu0  ;;  %v1007_v0 = vpop.f32.mrb[22].mxu1  ;;  %v3967_v47 = vld [vmem:[%s4354_s2 + $0x8] ss:$16 sps:$4 sm:$0xff]   ;;  %v3976_v48 = vld [vmem:[%s4354_s2 + $0x24] ss:$16 sps:$4 sm:$0xff]  }
 0x204   :  { %v3020_v7 = vmul.f32 -1.442695, %v1010_v8  ;;  %v967_v1 = vpop.f32.mrb[23].mxu0  ;;  %v1008_v9 = vpop.f32.mrb[23].mxu1  ;;  %v3022_v52 = vmul.f32 -1.442695, %v1012_v55 }
 0x205   :  { %v3021_v45 = vmul.f32 -1.442695, %v1011_v49  ;;  %v3957_v8 = vld [vmem:[%s4354_s2 + $0xc] ss:$16 sps:$4 sm:$0xff]   ;;  %v3962_v55 = vld [vmem:[%s4354_s2] ss:$16 sps:$4 sm:$0xff]  }
 0x206   :  { %3397 = vpow2.f32 %v3020_v7  ;;  %1593 = vmatprep.subr.bf16.mxu1 %v3957_v8  ;;  %v3981_v49 = vld [vmem:[%s4354_s2 + $0x2c] ss:$16 sps:$4 sm:$0xff]   ;;  %v3991_v57 = vld [vmem:[%s4354_s2 + $0x28] ss:$16 sps:$4 sm:$0xff]  }
 0x207   :  { %3399 = vpow2.f32 %v3021_v45 }
 0x208   :  { %3401 = vtanh.f32 %v1013_v50  ;;  %v3986_v50 = vld [vmem:[%s4354_s2 + $0x20] ss:$16 sps:$4 sm:$0xff]  }
 0x209   :  { %3403 = vpow2.f32 %v3022_v52 }
 0x210   :  { %v3398_v38 = vpop.eup %3397 }
 0x211   :  { %v1023_v53 = vadd.f32 1.0, %v3398_v38  ;;  %v3400_v13 = vpop.eup %3399 }
 0x212   :  { %v1024_v19 = vadd.f32 1.0, %v3400_v13  ;;  %v3402_v5 = vpop.eup %3401 }
 0x213   :  { %3405 = vrcp.f32 %v1023_v53  ;;  %v3404_v6 = vpop.eup %3403 }
 0x214   :  { %3407 = vrcp.f32 %v1024_v19  ;;  %v1025_v46 = vadd.f32 1.0, %v3404_v6  ;;  %v4045_v19 = vld [vmem:[%s4354_s2 + $0x44] ss:$16 sps:$4 sm:$0xff]   ;;  %v4055_v6 = vld [vmem:[%s4354_s2 + $0x40] ss:$16 sps:$4 sm:$0xff]  }
 0x216   :  { %3409 = vrcp.f32 %v1025_v46  ;;  %v4079_v46 = vld [vmem:[%s4354_s2 + $0x60] ss:$16 sps:$4 sm:$0xff]  }
 0x21d   :  { %v3406_v54 = vpop.eup %3405 }
 0x21e   :  { %v1034_v4 = vmul.f32 %v3406_v54, %v3402_v5  ;;  %v3408_v11 = vpop.eup %3407  ;;  %v4050_v5 = vld [vmem:[%s4354_s2 + $0x4c] ss:$16 sps:$4 sm:$0xff]   ;;  %v4060_v54 = vld [vmem:[%s4354_s2 + $0x48] ss:$16 sps:$4 sm:$0xff]  }
 0x21f   :  { %v1033_v10 = vmul.f32 %v3408_v11, %v3898_v29  ;;  %v3952_v29 = vld [vmem:[%s4354_s2 + $0x4] ss:$16 sps:$4 sm:$0xff]   ;;  %v4074_v11 = vld [vmem:[%s4354_s2 + $0x6c] ss:$16 sps:$4 sm:$0xff]  }
 0x220   :  { %v3410_v14 = vpop.eup %3409  ;;  %1552 = vmatprep.subr.bf16.mxu0 %v3952_v29 }
 0x221   :  { %v3941_v12 = vadd.f32 %v1034_v4, %v1033_v10  ;;  %v4069_v4 = vld [vmem:[%s4354_s2 + $0x64] ss:$16 sps:$4 sm:$0xff]   ;;  %v4084_v10 = vld [vmem:[%s4354_s2 + $0x68] ss:$16 sps:$4 sm:$0xff]  }
 0x223   :  { %3411 = vtanh.f32 %v3941_v12 }
 0x22d   :  { %v3412_v15 = vpop.eup %3411 }
 0x22e   :  { %v1037_v16 = vmul.f32 %v3412_v15, %v3410_v14  ;;  %v4098_v14 = vld [vmem:[%s4354_s2 + $0x8c] ss:$16 sps:$4 sm:$0xff]   ;;  %v4103_v15 = vld [vmem:[%s4354_s2 + $0x80] ss:$16 sps:$4 sm:$0xff]  }
 0x230   :  { %v1038_v17 = vpack.c.bf16 %v1037_v16, %v1037_v16  ;;  %v4108_v16 = vld [vmem:[%s4354_s2 + $0x88] ss:$16 sps:$4 sm:$0xff]  }
 0x232   :  { %3023 = vst [vmem:[%s4356_s4 + $0x4] sm:$0xf] %v1038_v17  ;;  %1273 = vmatmul.mubr.bf16.vlgmr.msra.gmra.mrb[24].mxu0 %v1038_v17  ;;  %1314 = vmatmul.mubr.bf16.vlgmr.msra.gmra.mrb[24].mxu1 %v1038_v17  ;;  %v4117_v17 = vld [vmem:[%s4354_s2 + $0xa0] ss:$16 sps:$4 sm:$0xff]  }
 0x233   :  { %1584 = vmatprep.mubr.bf16.mxu0 %v4365_v59  ;;  %1625 = vmatprep.mubr.bf16.mxu1 %v4365_v59 }
 0x234   :  { %1553 = vmatpush1.bf16.msra.mxu0 %v3962_v55  ;;  %1594 = vmatpush1.bf16.msra.mxu1 %v3967_v47 }
 0x235   :  { %1554 = vmatprep.subr.bf16.mxu0 %v3976_v48  ;;  %1595 = vmatprep.subr.bf16.mxu1 %v3981_v49 }
 0x238   :  { %1555 = vmatpush1.bf16.msra.mxu0 %v3986_v50  ;;  %1596 = vmatpush1.bf16.msra.mxu1 %v3991_v57 }
 0x239   :  { %1556 = vmatprep.subr.bf16.mxu0 %v3615_v18  ;;  %1597 = vmatprep.subr.bf16.mxu1 %v3625_v20  ;;  %v1044_v18 = vunpack.c.l.bf16 %v3852_v61  ;;  %v1046_v20 = vunpack.c.l.bf16 %v3855_v63 }
 0x23c   :  { %1557 = vmatpush1.bf16.msra.mxu0 %v3632_v21  ;;  %1598 = vmatpush1.bf16.msra.mxu1 %v3637_v22 }
 0x23d   :  { %1558 = vmatprep.subr.bf16.mxu0 %v3644_v23  ;;  %1599 = vmatprep.subr.bf16.mxu1 %v3649_v24  ;;  %v1045_v23 = vunpack.c.h.bf16 %v3852_v61  ;;  %v1047_v24 = vunpack.c.h.bf16 %v3855_v63 }
 0x240   :  { %1559 = vmatpush1.bf16.msra.mxu0 %v3656_v25  ;;  %1600 = vmatpush1.bf16.msra.mxu1 %v3663_v26 }
 0x241   :  { %1560 = vmatprep.subr.bf16.mxu0 %v3670_v27  ;;  %1601 = vmatprep.subr.bf16.mxu1 %v3675_v28 }
 0x244   :  { %1561 = vmatpush1.bf16.msra.mxu0 %v3685_v30  ;;  %1602 = vmatpush1.bf16.msra.mxu1 %v3690_v31 }
 0x245   :  { %1562 = vmatprep.subr.bf16.mxu0 %v3697_v32  ;;  %1603 = vmatprep.subr.bf16.mxu1 %v3704_v33 }
 0x248   :  { %1563 = vmatpush1.bf16.msra.mxu0 %v3711_v34  ;;  %1604 = vmatpush1.bf16.msra.mxu1 %v3716_v35 }
 0x249   :  { %1564 = vmatprep.subr.bf16.mxu0 %v3723_v36  ;;  %1605 = vmatprep.subr.bf16.mxu1 %v3730_v37 }
 0x24c   :  { %1565 = vmatpush1.bf16.msra.mxu0 %v3740_v39  ;;  %1606 = vmatpush1.bf16.msra.mxu1 %v3745_v40 }
 0x24d   :  { %1566 = vmatprep.subr.bf16.mxu0 %v3750_v41  ;;  %1607 = vmatprep.subr.bf16.mxu1 %v3755_v42 }
 0x250   :  { %1567 = vmatpush1.bf16.msra.mxu0 %v3764_v43  ;;  %1608 = vmatpush1.bf16.msra.mxu1 %v3769_v44 }
 0x251   :  { %1864 = vmatprep.subr.bf16.mxu0 %v3952_v29  ;;  %1905 = vmatprep.subr.bf16.mxu1 %v3957_v8 }
 0x305   :  { %v1274_v21 = vpop.f32.mrb[24].mxu0  ;;  %v1315_v22 = vpop.f32.mrb[24].mxu1 }
 0x306   :  { %v1322_v25 = vadd.f32 %v1274_v21, %v1044_v18  ;;  %v1324_v26 = vadd.f32 %v1315_v22, %v1046_v20  ;;  %v1276_v27 = vpop.f32.mrb[25].mxu0  ;;  %v1317_v28 = vpop.f32.mrb[25].mxu1  ;;  %v4122_v18 = vld [vmem:[%s4354_s2 + $0xa4] ss:$16 sps:$4 sm:$0xff]   ;;  %v4127_v20 = vld [vmem:[%s4354_s2 + $0xa8] ss:$16 sps:$4 sm:$0xff]  }
 0x307   :  { %v1323_v30 = vadd.f32 %v1276_v27, %v1045_v23  ;;  %v1325_v31 = vadd.f32 %v1317_v28, %v1047_v24  ;;  %v1278_v32 = vpop.f32.mrb[26].mxu0  ;;  %v1319_v33 = vpop.f32.mrb[26].mxu1  ;;  %v4132_v21 = vld [vmem:[%s4354_s2 + $0xac] ss:$16 sps:$4 sm:$0xff]   ;;  %v4137_v22 = vld [vmem:[%s4354_s2 + $0xc4] ss:$16 sps:$4 sm:$0xff]  }
 0x308   :  { %v3056_v34 = vmul.f32 -1.442695, %v1322_v25  ;;  %v1279_v35 = vpop.f32.mrb[27].mxu0  ;;  %v1320_v36 = vpop.f32.mrb[27].mxu1  ;;  %v3058_v39 = vmul.f32 -1.442695, %v1324_v26  ;;  %v1358_v32 = vunpack.c.l.bf16 %v3860_v3 }
 0x309   :  { %v3057_v37 = vmul.f32 -1.442695, %v1323_v30  ;;  %v4143_v23 = vld [vmem:[%s4354_s2 + $0xcc] ss:$16 sps:$4 sm:$0xff]   ;;  %v4151_v24 = vld [vmem:[%s4354_s2 + $0xc0] ss:$16 sps:$4 sm:$0xff]   ;;  %v1357_v35 = vunpack.c.h.bf16 %v3858_v2  ;;  %v1359_v36 = vunpack.c.h.bf16 %v3860_v3 }
 0x30a   :  { %3413 = vpow2.f32 %v3056_v34  ;;  %v4156_v25 = vld [vmem:[%s4354_s2 + $0xc8] ss:$16 sps:$4 sm:$0xff]   ;;  %v4163_v26 = vld [vmem:[%s4354_s2 + $0xe4] ss:$16 sps:$4 sm:$0xff]   ;;  %v4168_v27 = vld [vmem:[%s4354_s2 + $0xec] ss:$16 sps:$4 sm:$0xff]  }
 0x30b   :  { %3415 = vpow2.f32 %v3057_v37  ;;  %v4175_v28 = vld [vmem:[%s4354_s2 + $0xe0] ss:$16 sps:$4 sm:$0xff]   ;;  %v4180_v30 = vld [vmem:[%s4354_s2 + $0xe8] ss:$16 sps:$4 sm:$0xff]  }
 0x30c   :  { %3417 = vtanh.f32 %v1325_v31  ;;  %v1356_v31 = vunpack.c.l.bf16 %v3858_v2 }
 0x30d   :  { %3419 = vpow2.f32 %v3058_v39 }
 0x314   :  { %v3414_v40 = vpop.eup %3413 }
 0x315   :  { %v1335_v41 = vadd.f32 1.0, %v3414_v40  ;;  %v3416_v42 = vpop.eup %3415 }
 0x316   :  { %v1336_v43 = vadd.f32 1.0, %v3416_v42  ;;  %v3418_v44 = vpop.eup %3417 }
 0x317   :  { %3421 = vrcp.f32 %v1335_v41  ;;  %v3420_v61 = vpop.eup %3419 }
 0x318   :  { %3423 = vrcp.f32 %v1336_v43  ;;  %v1337_v1 = vadd.f32 1.0, %v3420_v61 }
 0x31a   :  { %3425 = vrcp.f32 %v1337_v1 }
 0x321   :  { %v3422_v63 = vpop.eup %3421 }
 0x322   :  { %v1346_v0 = vmul.f32 %v3422_v63, %v3418_v44  ;;  %v3424_v7 = vpop.eup %3423 }
 0x323   :  { %v1345_v9 = vmul.f32 %v3424_v7, %v3941_v12  ;;  %v4093_v12 = vld [vmem:[%s4354_s2 + $0x84] ss:$16 sps:$4 sm:$0xff]  }
 0x324   :  { %v3426_v52 = vpop.eup %3425 }
 0x325   :  { %v4028_v45 = vadd.f32 %v1346_v0, %v1345_v9 }
 0x327   :  { %3427 = vtanh.f32 %v4028_v45 }
 0x331   :  { %v3428_v38 = vpop.eup %3427 }
 0x332   :  { %v1349_v53 = vmul.f32 %v3428_v38, %v3426_v52 }
 0x334   :  { %v1350_v13 = vpack.c.bf16 %v1349_v53, %v1349_v53 }
 0x336   :  { %3059 = vst [vmem:[%s4356_s4 + $0x8] sm:$0xf] %v1350_v13  ;;  %1585 = vmatmul.mubr.bf16.vlgmr.msra.gmra.mrb[28].mxu0 %v1350_v13  ;;  %1626 = vmatmul.mubr.bf16.vlgmr.msra.gmra.mrb[28].mxu1 %v1350_v13 }
 0x337   :  { %1865 = vmatpush1.bf16.msra.mxu0 %v3962_v55  ;;  %1906 = vmatpush1.bf16.msra.mxu1 %v3967_v47 }
 0x338   :  { %1866 = vmatprep.subr.bf16.mxu0 %v3976_v48  ;;  %1907 = vmatprep.subr.bf16.mxu1 %v3981_v49 }
 0x339   :  { %1896 = vmatprep.mubr.bf16.mxu0 %v4365_v59  ;;  %1937 = vmatprep.mubr.bf16.mxu1 %v4365_v59 }
 0x33b   :  { %1867 = vmatpush1.bf16.msra.mxu0 %v3986_v50  ;;  %1908 = vmatpush1.bf16.msra.mxu1 %v3991_v57 }
 0x33c   :  { %1868 = vmatprep.subr.bf16.mxu0 %v4045_v19  ;;  %1909 = vmatprep.subr.bf16.mxu1 %v4050_v5 }
 0x33f   :  { %1869 = vmatpush1.bf16.msra.mxu0 %v4055_v6  ;;  %1910 = vmatpush1.bf16.msra.mxu1 %v4060_v54 }
 0x340   :  { %1870 = vmatprep.subr.bf16.mxu0 %v4069_v4  ;;  %1911 = vmatprep.subr.bf16.mxu1 %v4074_v11 }
 0x343   :  { %1871 = vmatpush1.bf16.msra.mxu0 %v4079_v46  ;;  %1912 = vmatpush1.bf16.msra.mxu1 %v4084_v10 }
 0x344   :  { %1872 = vmatprep.subr.bf16.mxu0 %v4093_v12  ;;  %1913 = vmatprep.subr.bf16.mxu1 %v4098_v14 }
 0x347   :  { %1873 = vmatpush1.bf16.msra.mxu0 %v4103_v15  ;;  %1914 = vmatpush1.bf16.msra.mxu1 %v4108_v16 }
 0x348   :  { %1874 = vmatprep.subr.bf16.mxu0 %v4122_v18  ;;  %1915 = vmatprep.subr.bf16.mxu1 %v4132_v21 }
 0x34b   :  { %1875 = vmatpush1.bf16.msra.mxu0 %v4117_v17  ;;  %1916 = vmatpush1.bf16.msra.mxu1 %v4127_v20 }
 0x34c   :  { %1876 = vmatprep.subr.bf16.mxu0 %v4137_v22  ;;  %1917 = vmatprep.subr.bf16.mxu1 %v4143_v23 }
 0x34f   :  { %1877 = vmatpush1.bf16.msra.mxu0 %v4151_v24  ;;  %1918 = vmatpush1.bf16.msra.mxu1 %v4156_v25 }
 0x350   :  { %1878 = vmatprep.subr.bf16.mxu0 %v4163_v26  ;;  %1919 = vmatprep.subr.bf16.mxu1 %v4168_v27 }
 0x353   :  { %1879 = vmatpush1.bf16.msra.mxu0 %v4175_v28  ;;  %1920 = vmatpush1.bf16.msra.mxu1 %v4180_v30 }
 0x354   :  { %2176 = vmatprep.subr.bf16.mxu0 %v3952_v29  ;;  %2217 = vmatprep.subr.bf16.mxu1 %v3957_v8 }
 0x409   :  { %v1586_v33 = vpop.f32.mrb[28].mxu0  ;;  %v1627_v34 = vpop.f32.mrb[28].mxu1 }
 0x40a   :  { %v1634_v37 = vadd.f32 %v1586_v33, %v1356_v31  ;;  %v1636_v39 = vadd.f32 %v1627_v34, %v1358_v32  ;;  %v1588_v40 = vpop.f32.mrb[29].mxu0  ;;  %v1629_v41 = vpop.f32.mrb[29].mxu1 }
 0x40b   :  { %v1635_v42 = vadd.f32 %v1588_v40, %v1357_v35  ;;  %v1637_v43 = vadd.f32 %v1629_v41, %v1359_v36  ;;  %v1590_v44 = vpop.f32.mrb[30].mxu0  ;;  %v1631_v61 = vpop.f32.mrb[30].mxu1 }
 0x40c   :  { %v3092_v63 = vmul.f32 -1.442695, %v1634_v37  ;;  %v1591_v0 = vpop.f32.mrb[31].mxu0  ;;  %v1632_v7 = vpop.f32.mrb[31].mxu1  ;;  %v3094_v9 = vmul.f32 -1.442695, %v1636_v39  ;;  %v1669_v61 = vunpack.c.h.bf16 %v3868_v56 }
 0x40d   :  { %v3093_v1 = vmul.f32 -1.442695, %v1635_v42  ;;  %v1670_v42 = vunpack.c.l.bf16 %v3871_v58 }
 0x40e   :  { %3429 = vpow2.f32 %v3092_v63  ;;  %v1671_v63 = vunpack.c.h.bf16 %v3871_v58 }
 0x40f   :  { %3431 = vpow2.f32 %v3093_v1 }
 0x410   :  { %3433 = vtanh.f32 %v1637_v43 }
 0x411   :  { %3435 = vpow2.f32 %v3094_v9 }
 0x418   :  { %v3430_v52 = vpop.eup %3429 }
 0x419   :  { %v1647_v38 = vadd.f32 1.0, %v3430_v52  ;;  %v3432_v2 = vpop.eup %3431 }
 0x41a   :  { %v1648_v3 = vadd.f32 1.0, %v3432_v2  ;;  %v3434_v53 = vpop.eup %3433 }
 0x41b   :  { %3437 = vrcp.f32 %v1647_v38  ;;  %v3436_v13 = vpop.eup %3435 }
 0x41c   :  { %3439 = vrcp.f32 %v1648_v3  ;;  %v1649_v34 = vadd.f32 1.0, %v3436_v13 }
 0x41e   :  { %3441 = vrcp.f32 %v1649_v34 }
 0x425   :  { %v3438_v31 = vpop.eup %3437 }
 0x426   :  { %v1658_v32 = vmul.f32 %v3438_v31, %v3434_v53  ;;  %v3440_v33 = vpop.eup %3439 }
 0x427   :  { %v1657_v35 = vmul.f32 %v3440_v33, %v4028_v45  ;;  %v1668_v45 = vunpack.c.l.bf16 %v3868_v56 }
 0x428   :  { %v3442_v37 = vpop.eup %3441 }
 0x429   :  { %v4193_v36 = vadd.f32 %v1658_v32, %v1657_v35 }
 0x42b   :  { %3443 = vtanh.f32 %v4193_v36 }
 0x435   :  { %v3444_v39 = vpop.eup %3443 }
 0x436   :  { %v1661_v40 = vmul.f32 %v3444_v39, %v3442_v37 }
 0x438   :  { %v1662_v41 = vpack.c.bf16 %v1661_v40, %v1661_v40 }
 0x43a   :  { %3095 = vst [vmem:[%s4356_s4 + $0xc] sm:$0xf] %v1662_v41  ;;  %1897 = vmatmul.mubr.bf16.vlgmr.msra.gmra.mrb[32].mxu0 %v1662_v41  ;;  %1938 = vmatmul.mubr.bf16.vlgmr.msra.gmra.mrb[32].mxu1 %v1662_v41 }
 0x43b   :  { %2177 = vmatpush1.bf16.msra.mxu0 %v3962_v55  ;;  %2218 = vmatpush1.bf16.msra.mxu1 %v3967_v47 }
 0x43c   :  { %2178 = vmatprep.subr.bf16.mxu0 %v3976_v48  ;;  %2219 = vmatprep.subr.bf16.mxu1 %v3981_v49 }
 0x43d   :  { %2208 = vmatprep.mubr.bf16.mxu0 %v4365_v59  ;;  %2249 = vmatprep.mubr.bf16.mxu1 %v4365_v59 }
 0x43f   :  { %2179 = vmatpush1.bf16.msra.mxu0 %v3986_v50  ;;  %2220 = vmatpush1.bf16.msra.mxu1 %v3991_v57 }
 0x440   :  { %2180 = vmatprep.subr.bf16.mxu0 %v4045_v19  ;;  %2221 = vmatprep.subr.bf16.mxu1 %v4050_v5 }
 0x443   :  { %2181 = vmatpush1.bf16.msra.mxu0 %v4055_v6  ;;  %2222 = vmatpush1.bf16.msra.mxu1 %v4060_v54 }
 0x444   :  { %2182 = vmatprep.subr.bf16.mxu0 %v4069_v4  ;;  %2223 = vmatprep.subr.bf16.mxu1 %v4074_v11 }
 0x447   :  { %2183 = vmatpush1.bf16.msra.mxu0 %v4079_v46  ;;  %2224 = vmatpush1.bf16.msra.mxu1 %v4084_v10 }
 0x448   :  { %2184 = vmatprep.subr.bf16.mxu0 %v4093_v12  ;;  %2225 = vmatprep.subr.bf16.mxu1 %v4098_v14 }
 0x44b   :  { %2185 = vmatpush1.bf16.msra.mxu0 %v4103_v15  ;;  %2226 = vmatpush1.bf16.msra.mxu1 %v4108_v16 }
 0x44c   :  { %2186 = vmatprep.subr.bf16.mxu0 %v4122_v18  ;;  %2227 = vmatprep.subr.bf16.mxu1 %v4132_v21 }
 0x44f   :  { %2187 = vmatpush1.bf16.msra.mxu0 %v4117_v17  ;;  %2228 = vmatpush1.bf16.msra.mxu1 %v4127_v20 }
 0x450   :  { %2188 = vmatprep.subr.bf16.mxu0 %v4137_v22  ;;  %2229 = vmatprep.subr.bf16.mxu1 %v4143_v23 }
 0x453   :  { %2189 = vmatpush1.bf16.msra.mxu0 %v4151_v24  ;;  %2230 = vmatpush1.bf16.msra.mxu1 %v4156_v25 }
 0x454   :  { %2190 = vmatprep.subr.bf16.mxu0 %v4163_v26  ;;  %2231 = vmatprep.subr.bf16.mxu1 %v4168_v27 }
 0x457   :  { %2191 = vmatpush1.bf16.msra.mxu0 %v4175_v28  ;;  %2232 = vmatpush1.bf16.msra.mxu1 %v4180_v30 }
 0x458   :  { %2488 = vmatprep.subr.bf16.mxu0 %v3952_v29  ;;  %2529 = vmatprep.subr.bf16.mxu1 %v3957_v8 }
 0x50d   :  { %v1898_v43 = vpop.f32.mrb[32].mxu0  ;;  %v1939_v44 = vpop.f32.mrb[32].mxu1 }
 0x50e   :  { %v1946_v0 = vadd.f32 %v1898_v43, %v1668_v45  ;;  %v1948_v7 = vadd.f32 %v1939_v44, %v1670_v42  ;;  %v1900_v1 = vpop.f32.mrb[33].mxu0  ;;  %v1941_v9 = vpop.f32.mrb[33].mxu1 }
 0x50f   :  { %v1947_v52 = vadd.f32 %v1900_v1, %v1669_v61  ;;  %v1949_v38 = vadd.f32 %v1941_v9, %v1671_v63  ;;  %v1902_v2 = vpop.f32.mrb[34].mxu0  ;;  %v1943_v29 = vpop.f32.mrb[34].mxu1 }
 0x510   :  { %v3128_v3 = vmul.f32 -1.442695, %v1946_v0  ;;  %v1903_v8 = vpop.f32.mrb[35].mxu0  ;;  %v1944_v53 = vpop.f32.mrb[35].mxu1  ;;  %v3130_v31 = vmul.f32 -1.442695, %v1948_v7 }
 0x511   :  { %v3129_v13 = vmul.f32 -1.442695, %v1947_v52 }
 0x512   :  { %3445 = vpow2.f32 %v3128_v3 }
 0x513   :  { %3447 = vpow2.f32 %v3129_v13 }
 0x514   :  { %3449 = vtanh.f32 %v1949_v38 }
 0x515   :  { %3451 = vpow2.f32 %v3130_v31 }
 0x51c   :  { %v3446_v32 = vpop.eup %3445 }
 0x51d   :  { %v1959_v33 = vadd.f32 1.0, %v3446_v32  ;;  %v3448_v56 = vpop.eup %3447 }
 0x51e   :  { %v1960_v58 = vadd.f32 1.0, %v3448_v56  ;;  %v3450_v34 = vpop.eup %3449 }
 0x51f   :  { %3453 = vrcp.f32 %v1959_v33  ;;  %v3452_v35 = vpop.eup %3451 }
 0x520   :  { %3455 = vrcp.f32 %v1960_v58  ;;  %v1961_v41 = vadd.f32 1.0, %v3452_v35 }
 0x522   :  { %3457 = vrcp.f32 %v1961_v41 }
 0x529   :  { %v3454_v37 = vpop.eup %3453 }
 0x52a   :  { %v1970_v39 = vmul.f32 %v3454_v37, %v3450_v34  ;;  %v3456_v40 = vpop.eup %3455 }
 0x52b   :  { %v1969_v45 = vmul.f32 %v3456_v40, %v4193_v36 }
 0x52c   :  { %v3458_v43 = vpop.eup %3457 }
 0x52d   :  { %v4238_v42 = vadd.f32 %v1970_v39, %v1969_v45 }
 0x52f   :  { %3459 = vtanh.f32 %v4238_v42 }
 0x539   :  { %v3460_v44 = vpop.eup %3459 }
 0x53a   :  { %v1973_v61 = vmul.f32 %v3460_v44, %v3458_v43 }
 0x53c   :  { %v1974_v63 = vpack.c.bf16 %v1973_v61, %v1973_v61  ;;  %v3374_v61 = vld [vmem:[%s4354_s2 + $0xc] ss:$16 sps:$4 sm:$0xff]  }
 0x53e   :  { %3131 = vst [vmem:[%s4356_s4 + $0x10] sm:$0xf] %v1974_v63  ;;  %2209 = vmatmul.mubr.bf16.vlgmr.msra.gmra.mrb[36].mxu0 %v1974_v63  ;;  %2250 = vmatmul.mubr.bf16.vlgmr.msra.gmra.mrb[36].mxu1 %v1974_v63  ;;  %v3369_v63 = vld [vmem:[%s4354_s2] ss:$16 sps:$4 sm:$0xff]  }
 0x53f   :  { %2489 = vmatpush1.bf16.msra.mxu0 %v3962_v55  ;;  %2530 = vmatpush1.bf16.msra.mxu1 %v3967_v47  ;;  %v1980_v55 = vunpack.c.l.bf16 %v3874_v60  ;;  %v1982_v47 = vunpack.c.l.bf16 %v3876_v62 }
 0x540   :  { %2490 = vmatprep.subr.bf16.mxu0 %v3976_v48  ;;  %2531 = vmatprep.subr.bf16.mxu1 %v3981_v49 }
 0x541   :  { %2520 = vmatprep.mubr.bf16.mxu0 %v4365_v59  ;;  %2561 = vmatprep.mubr.bf16.mxu1 %v4365_v59 }
 0x543   :  { %2491 = vmatpush1.bf16.msra.mxu0 %v3986_v50  ;;  %2532 = vmatpush1.bf16.msra.mxu1 %v3991_v57  ;;  %v1981_v50 = vunpack.c.h.bf16 %v3874_v60  ;;  %v1983_v57 = vunpack.c.h.bf16 %v3876_v62 }
 0x544   :  { %2492 = vmatprep.subr.bf16.mxu0 %v4045_v19  ;;  %2533 = vmatprep.subr.bf16.mxu1 %v4050_v5 }
 0x547   :  { %2493 = vmatpush1.bf16.msra.mxu0 %v4055_v6  ;;  %2534 = vmatpush1.bf16.msra.mxu1 %v4060_v54 }
 0x548   :  { %2494 = vmatprep.subr.bf16.mxu0 %v4069_v4  ;;  %2535 = vmatprep.subr.bf16.mxu1 %v4074_v11 }
 0x54b   :  { %2495 = vmatpush1.bf16.msra.mxu0 %v4079_v46  ;;  %2536 = vmatpush1.bf16.msra.mxu1 %v4084_v10 }
 0x54c   :  { %2496 = vmatprep.subr.bf16.mxu0 %v4093_v12  ;;  %2537 = vmatprep.subr.bf16.mxu1 %v4098_v14 }
 0x54f   :  { %2497 = vmatpush1.bf16.msra.mxu0 %v4103_v15  ;;  %2538 = vmatpush1.bf16.msra.mxu1 %v4108_v16 }
 0x550   :  { %2498 = vmatprep.subr.bf16.mxu0 %v4122_v18  ;;  %2539 = vmatprep.subr.bf16.mxu1 %v4132_v21 }
 0x553   :  { %2499 = vmatpush1.bf16.msra.mxu0 %v4117_v17  ;;  %2540 = vmatpush1.bf16.msra.mxu1 %v4127_v20 }
 0x554   :  { %2500 = vmatprep.subr.bf16.mxu0 %v4137_v22  ;;  %2541 = vmatprep.subr.bf16.mxu1 %v4143_v23 }
 0x557   :  { %2501 = vmatpush1.bf16.msra.mxu0 %v4151_v24  ;;  %2542 = vmatpush1.bf16.msra.mxu1 %v4156_v25 }
 0x558   :  { %2502 = vmatprep.subr.bf16.mxu0 %v4163_v26  ;;  %2543 = vmatprep.subr.bf16.mxu1 %v4168_v27 }
 0x55b   :  { %2503 = vmatpush1.bf16.msra.mxu0 %v4175_v28  ;;  %2544 = vmatpush1.bf16.msra.mxu1 %v4180_v30 }
 0x55c   :  { %2841 = vmatprep.subr.bf16.mxu1 %v3374_v61 }
 0x611   :  { %v2210_v48 = vpop.f32.mrb[36].mxu0  ;;  %v2251_v49 = vpop.f32.mrb[36].mxu1 }
 0x612   :  { %v2258_v36 = vadd.f32 %v2210_v48, %v1980_v55  ;;  %v2260_v0 = vadd.f32 %v2251_v49, %v1982_v47  ;;  %v2212_v7 = vpop.f32.mrb[37].mxu0  ;;  %v2253_v1 = vpop.f32.mrb[37].mxu1  ;;  %v3372_v55 = vld [vmem:[%s4354_s2 + $0x8] ss:$16 sps:$4 sm:$0xff]   ;;  %v3380_v47 = vld [vmem:[%s4354_s2 + $0x2c] ss:$16 sps:$4 sm:$0xff]  }
 0x613   :  { %v2259_v9 = vadd.f32 %v2212_v7, %v1981_v50  ;;  %v2261_v52 = vadd.f32 %v2253_v1, %v1983_v57  ;;  %v2214_v38 = vpop.f32.mrb[38].mxu0  ;;  %v2255_v2 = vpop.f32.mrb[38].mxu1  ;;  %v3375_v48 = vld [vmem:[%s4354_s2 + $0x20] ss:$16 sps:$4 sm:$0xff]   ;;  %v3378_v49 = vld [vmem:[%s4354_s2 + $0x28] ss:$16 sps:$4 sm:$0xff]  }
 0x614   :  { %v3164_v29 = vmul.f32 -1.442695, %v2258_v36  ;;  %v2215_v3 = vpop.f32.mrb[39].mxu0  ;;  %v2256_v8 = vpop.f32.mrb[39].mxu1  ;;  %v3166_v13 = vmul.f32 -1.442695, %v2260_v0 }
 0x615   :  { %v3165_v53 = vmul.f32 -1.442695, %v2259_v9  ;;  %v4367_v3 = vld [vmem:[#allocation4_spill] sm:$0xff] }
 0x616   :  { %3461 = vpow2.f32 %v3164_v29  ;;  %v2604_v8 = vunpack.c.l.bf16 %v4367_v3 }
 0x617   :  { %3463 = vpow2.f32 %v3165_v53  ;;  %v4368_v53 = vld [vmem:[#allocation5_spill] sm:$0xff] }
 0x618   :  { %3465 = vtanh.f32 %v2261_v52 }
 0x619   :  { %3467 = vpow2.f32 %v3166_v13  ;;  %v2606_v13 = vunpack.c.l.bf16 %v4368_v53 }
 0x620   :  { %v3462_v31 = vpop.eup %3461 }
 0x621   :  { %v2271_v32 = vadd.f32 1.0, %v3462_v31  ;;  %v3464_v60 = vpop.eup %3463 }
 0x622   :  { %v2272_v62 = vadd.f32 1.0, %v3464_v60  ;;  %v3466_v33 = vpop.eup %3465  ;;  %v2605_v60 = vunpack.c.h.bf16 %v4367_v3 }
 0x623   :  { %3469 = vrcp.f32 %v2271_v32  ;;  %v3468_v56 = vpop.eup %3467 }
 0x624   :  { %3471 = vrcp.f32 %v2272_v62  ;;  %v2273_v37 = vadd.f32 1.0, %v3468_v56  ;;  %v2607_v62 = vunpack.c.h.bf16 %v4368_v53 }
 0x626   :  { %3473 = vrcp.f32 %v2273_v37 }
 0x62d   :  { %v3470_v58 = vpop.eup %3469 }
 0x62e   :  { %v2282_v34 = vmul.f32 %v3470_v58, %v3466_v33  ;;  %v3472_v35 = vpop.eup %3471 }
 0x62f   :  { %v2281_v39 = vmul.f32 %v3472_v35, %v4238_v42  ;;  %v3371_v42 = vld [vmem:[%s4354_s2 + $0x4] ss:$16 sps:$4 sm:$0xff]  }
 0x630   :  { %v3474_v41 = vpop.eup %3473  ;;  %2800 = vmatprep.subr.bf16.mxu0 %v3371_v42 }
 0x631   :  { %v4281_v40 = vadd.f32 %v2282_v34, %v2281_v39 }
 0x633   :  { %3475 = vtanh.f32 %v4281_v40 }
 0x63d   :  { %v3476_v45 = vpop.eup %3475 }
 0x63e   :  { %v2285_v43 = vmul.f32 %v3476_v45, %v3474_v41 }
 0x640   :  { %v2286_v44 = vpack.c.bf16 %v2285_v43, %v2285_v43 }
 0x642   :  { %3167 = vst [vmem:[%s4356_s4 + $0x14] sm:$0xf] %v2286_v44  ;;  %2521 = vmatmul.mubr.bf16.vlgmr.msra.gmra.mrb[40].mxu0 %v2286_v44  ;;  %2562 = vmatmul.mubr.bf16.vlgmr.msra.gmra.mrb[40].mxu1 %v2286_v44 }
 0x643   :  { %2832 = vmatprep.mubr.bf16.mxu0 %v4365_v59  ;;  %2873 = vmatprep.mubr.bf16.mxu1 %v4365_v59  ;;  %v3377_v59 = vld [vmem:[%s4354_s2 + $0x24] ss:$16 sps:$4 sm:$0xff]  }
 0x644   :  { %2801 = vmatpush1.bf16.msra.mxu0 %v3369_v63  ;;  %2842 = vmatpush1.bf16.msra.mxu1 %v3372_v55 }
 0x645   :  { %2802 = vmatprep.subr.bf16.mxu0 %v3377_v59  ;;  %2843 = vmatprep.subr.bf16.mxu1 %v3380_v47 }
 0x648   :  { %2803 = vmatpush1.bf16.msra.mxu0 %v3375_v48  ;;  %2844 = vmatpush1.bf16.msra.mxu1 %v3378_v49 }
 0x649   :  { %2804 = vmatprep.subr.bf16.mxu0 %v4045_v19  ;;  %2845 = vmatprep.subr.bf16.mxu1 %v4050_v5  ;;  %v2292_v19 = vunpack.c.l.bf16 %v3884_v51  ;;  %v4366_v5 = vld [vmem:[#allocation3_spill] sm:$0xff] }
 0x64c   :  { %2805 = vmatpush1.bf16.msra.mxu0 %v4055_v6  ;;  %2846 = vmatpush1.bf16.msra.mxu1 %v4060_v54  ;;  %v2294_v6 = vunpack.c.l.bf16 %v4366_v5 }
 0x64d   :  { %2806 = vmatprep.subr.bf16.mxu0 %v4069_v4  ;;  %2847 = vmatprep.subr.bf16.mxu1 %v4074_v11  ;;  %v2293_v11 = vunpack.c.h.bf16 %v3884_v51 }
 0x650   :  { %2807 = vmatpush1.bf16.msra.mxu0 %v4079_v46  ;;  %2848 = vmatpush1.bf16.msra.mxu1 %v4084_v10  ;;  %v2295_v46 = vunpack.c.h.bf16 %v4366_v5 }
 0x651   :  { %2808 = vmatprep.subr.bf16.mxu0 %v4093_v12  ;;  %2849 = vmatprep.subr.bf16.mxu1 %v4098_v14 }
 0x654   :  { %2809 = vmatpush1.bf16.msra.mxu0 %v4103_v15  ;;  %2850 = vmatpush1.bf16.msra.mxu1 %v4108_v16 }
 0x655   :  { %2810 = vmatprep.subr.bf16.mxu0 %v4122_v18  ;;  %2851 = vmatprep.subr.bf16.mxu1 %v4132_v21 }
 0x658   :  { %2811 = vmatpush1.bf16.msra.mxu0 %v4117_v17  ;;  %2852 = vmatpush1.bf16.msra.mxu1 %v4127_v20 }
 0x659   :  { %2812 = vmatprep.subr.bf16.mxu0 %v4137_v22  ;;  %2853 = vmatprep.subr.bf16.mxu1 %v4143_v23 }
 0x65c   :  { %2813 = vmatpush1.bf16.msra.mxu0 %v4151_v24  ;;  %2854 = vmatpush1.bf16.msra.mxu1 %v4156_v25 }
 0x65d   :  { %2814 = vmatprep.subr.bf16.mxu0 %v4163_v26  ;;  %2855 = vmatprep.subr.bf16.mxu1 %v4168_v27 }
 0x660   :  { %2815 = vmatpush1.bf16.msra.mxu0 %v4175_v28  ;;  %2856 = vmatpush1.bf16.msra.mxu1 %v4180_v30 }
 0x715   :  { %v2522_v54 = vpop.f32.mrb[40].mxu0  ;;  %v2563_v4 = vpop.f32.mrb[40].mxu1 }
 0x716   :  { %v2570_v10 = vadd.f32 %v2522_v54, %v2292_v19  ;;  %v2572_v12 = vadd.f32 %v2563_v4, %v2294_v6  ;;  %v2524_v14 = vpop.f32.mrb[41].mxu0  ;;  %v2565_v15 = vpop.f32.mrb[41].mxu1 }
 0x717   :  { %v2571_v16 = vadd.f32 %v2524_v14, %v2293_v11  ;;  %v2573_v17 = vadd.f32 %v2565_v15, %v2295_v46  ;;  %v2526_v18 = vpop.f32.mrb[42].mxu0  ;;  %v2567_v20 = vpop.f32.mrb[42].mxu1 }
 0x718   :  { %v3200_v21 = vmul.f32 -1.442695, %v2570_v10  ;;  %v2527_v22 = vpop.f32.mrb[43].mxu0  ;;  %v2568_v23 = vpop.f32.mrb[43].mxu1  ;;  %v3202_v25 = vmul.f32 -1.442695, %v2572_v12 }
 0x719   :  { %v3201_v24 = vmul.f32 -1.442695, %v2571_v16 }
 0x71a   :  { %3477 = vpow2.f32 %v3200_v21 }
 0x71b   :  { %3479 = vpow2.f32 %v3201_v24 }
 0x71c   :  { %3481 = vtanh.f32 %v2573_v17 }
 0x71d   :  { %3483 = vpow2.f32 %v3202_v25 }
 0x724   :  { %v3478_v26 = vpop.eup %3477 }
 0x725   :  { %v2583_v27 = vadd.f32 1.0, %v3478_v26  ;;  %v3480_v51 = vpop.eup %3479 }
 0x726   :  { %v2584_v28 = vadd.f32 1.0, %v3480_v51  ;;  %v3482_v30 = vpop.eup %3481 }
 0x727   :  { %3485 = vrcp.f32 %v2583_v27  ;;  %v3484_v50 = vpop.eup %3483 }
 0x728   :  { %3487 = vrcp.f32 %v2584_v28  ;;  %v2585_v7 = vadd.f32 1.0, %v3484_v50 }
 0x72a   :  { %3489 = vrcp.f32 %v2585_v7 }
 0x731   :  { %v3486_v57 = vpop.eup %3485 }
 0x732   :  { %v2594_v36 = vmul.f32 %v3486_v57, %v3482_v30  ;;  %v3488_v0 = vpop.eup %3487 }
 0x733   :  { %v2593_v1 = vmul.f32 %v3488_v0, %v4281_v40 }
 0x734   :  { %v3490_v52 = vpop.eup %3489 }
 0x735   :  { %v2595_v9 = vadd.f32 %v2594_v36, %v2593_v1 }
 0x737   :  { %3491 = vtanh.f32 %v2595_v9 }
 0x741   :  { %v3492_v38 = vpop.eup %3491 }
 0x742   :  { %v2597_v2 = vmul.f32 %v3492_v38, %v3490_v52 }
 0x744   :  { %v2598_v29 = vpack.c.bf16 %v2597_v2, %v2597_v2 }
 0x746   :  { %3203 = vst [vmem:[%s4356_s4 + $0x18] sm:$0xf] %v2598_v29  ;;  %2833 = vmatmul.mubr.bf16.vlgmr.msra.gmra.mrb[44].mxu0 %v2598_v29  ;;  %2874 = vmatmul.mubr.bf16.vlgmr.msra.gmra.mrb[44].mxu1 %v2598_v29 }
 0x819   :  { %v2834_v31 = vpop.f32.mrb[44].mxu0  ;;  %v2875_v32 = vpop.f32.mrb[44].mxu1 }
 0x81a   :  { %v2882_v33 = vadd.f32 %v2834_v31, %v2604_v8  ;;  %v2884_v56 = vadd.f32 %v2875_v32, %v2606_v13  ;;  %v2836_v58 = vpop.f32.mrb[45].mxu0  ;;  %v2877_v34 = vpop.f32.mrb[45].mxu1 }
 0x81b   :  { %v2883_v35 = vadd.f32 %v2836_v58, %v2605_v60  ;;  %v2885_v37 = vadd.f32 %v2877_v34, %v2607_v62  ;;  %v2838_v39 = vpop.f32.mrb[46].mxu0  ;;  %v2879_v40 = vpop.f32.mrb[46].mxu1 }
 0x81c   :  { %v3236_v41 = vmul.f32 -1.442695, %v2882_v33  ;;  %v2839_v45 = vpop.f32.mrb[47].mxu0  ;;  %v2880_v43 = vpop.f32.mrb[47].mxu1  ;;  %v3238_v42 = vmul.f32 -1.442695, %v2884_v56 }
 0x81d   :  { %v3237_v44 = vmul.f32 -1.442695, %v2883_v35 }
 0x81e   :  { %3493 = vpow2.f32 %v3236_v41 }
 0x81f   :  { %3495 = vpow2.f32 %v3237_v44 }
 0x820   :  { %3497 = vtanh.f32 %v2885_v37 }
 0x821   :  { %3499 = vpow2.f32 %v3238_v42 }
 0x828   :  { %v3494_v61 = vpop.eup %3493 }
 0x829   :  { %v2895_v63 = vadd.f32 1.0, %v3494_v61  ;;  %v3496_v55 = vpop.eup %3495 }
 0x82a   :  { %v2896_v59 = vadd.f32 1.0, %v3496_v55  ;;  %v3498_v47 = vpop.eup %3497 }
 0x82b   :  { %3501 = vrcp.f32 %v2895_v63  ;;  %v3500_v48 = vpop.eup %3499 }
 0x82c   :  { %3503 = vrcp.f32 %v2896_v59  ;;  %v2897_v6 = vadd.f32 1.0, %v3500_v48 }
 0x82e   :  { %3505 = vrcp.f32 %v2897_v6 }
 0x835   :  { %v3502_v49 = vpop.eup %3501 }
 0x836   :  { %v2906_v19 = vmul.f32 %v3502_v49, %v3498_v47  ;;  %v3504_v5 = vpop.eup %3503 }
 0x837   :  { %v2905_v54 = vmul.f32 %v3504_v5, %v2595_v9 }
 0x838   :  { %v3506_v11 = vpop.eup %3505 }
 0x839   :  { %v2907_v4 = vadd.f32 %v2906_v19, %v2905_v54 }
 0x83b   :  { %3507 = vtanh.f32 %v2907_v4 }
 0x845   :  { %v3508_v46 = vpop.eup %3507 }
 0x846   :  { %v2909_v10 = vmul.f32 %v3508_v46, %v3506_v11 }
 0x848   :  { %v2910_v12 = vpack.c.bf16 %v2909_v10, %v2909_v10 }
 0x84a   :  { %3239 = vst [vmem:[%s4356_s4 + $0x1c] sm:$0xf] %v2910_v12 }

</bundles_post_ra>
